<compile_context>
chip_gen: v7x
topology: tpu7x:2x2x1
jax: 0.10.0
libtpu: 0.0.40
codegen_flags: <defaults>
</compile_context>

<pallas_src>
import jax
import jax.numpy as jnp
from jax.experimental import pallas as pl
from jax.experimental.pallas import tpu as pltpu


# ----------------------------- in-kernel helpers -----------------------------

def _conv3x3_banded(xpad, w_ref, bias_row):
    """3x3 'same' conv (BN scale pre-folded into w) + bias + ReLU.

    xpad:     (H+2, W*Cin) value, rows zero-padded, layout [h, w*Cin + ci]
    w_ref:    (3*W*Cin, W*Cout) ref: three stacked banded kh-slabs; the kw taps,
              the width 'same' padding and the folded BN scale are baked in,
              so each kh is ONE MXU matmul.
    bias_row: (1, W*Cout) folded BN bias (conv bias included), width-tiled.
    returns   (H, W*Cout) value, layout [h, w*Cout + co]
    """
    h = xpad.shape[0] - 2
    k = w_ref.shape[0] // 3
    acc = jnp.dot(xpad[0:h, :], w_ref[0:k, :],
                  preferred_element_type=jnp.float32)
    acc = acc + jnp.dot(xpad[1:h + 1, :], w_ref[k:2 * k, :],
                        preferred_element_type=jnp.float32)
    acc = acc + jnp.dot(xpad[2:h + 2, :], w_ref[2 * k:3 * k, :],
                        preferred_element_type=jnp.float32)
    return jnp.maximum(acc + bias_row, 0.0)


def _maxpool2x2_mxu(y, ps_ref, pr_ref):
    """2x2 / stride-2 max-pool of y (layout [h, w*C + c]) via two selection
    matmuls (MXU gathers) + elementwise max — no sub-128-lane masked stores.

    ps_ref: (W*C, 2*(W//2)*C) column selector [even-block picker | odd-block picker]
    pr_ref: (2*(H//2), H)     row selector    [even-row picker ; odd-row picker]
    returns (H//2, (W//2)*C) pooled value
    """
    n2 = ps_ref.shape[1] // 2
    h2 = pr_ref.shape[0] // 2
    z = jnp.dot(y, ps_ref[...], preferred_element_type=jnp.float32)    # (H, 2*W2*C)
    hp = jnp.maximum(z[:, :n2], z[:, n2:])                             # (H, W2*C)
    z2 = jnp.dot(pr_ref[...], hp, preferred_element_type=jnp.float32)  # (2*H2, W2*C)
    return jnp.maximum(z2[:h2, :], z2[h2:, :])                         # (H2, W2*C)


# --------------------------------- kernel ------------------------------------

def fused_cnn_kernel(x_ref, w1_ref, b1_ref, ps1_ref, pr1_ref,
                     w2_ref, b2_ref, ps2_ref, pr2_ref,
                     w3_ref, b3_ref, wf_ref, bf_ref,
                     out_ref, p1_ref, p2_ref):
    """Whole CNN forward for one image; all intermediates stay in VMEM."""
    h2 = pr1_ref.shape[0] // 2
    h3 = pr2_ref.shape[0] // 2
    zrow1 = jnp.zeros((1, p1_ref.shape[1]), p1_ref.dtype)
    zrow2 = jnp.zeros((1, p2_ref.shape[1]), p2_ref.dtype)

    # conv1 + BN + ReLU, then 2x2 maxpool into the row-padded p1 scratch
    y1 = _conv3x3_banded(x_ref[0], w1_ref, b1_ref[...])
    p1_ref[0:1, :] = zrow1
    p1_ref[1:1 + h2, :] = _maxpool2x2_mxu(y1, ps1_ref, pr1_ref)
    p1_ref[1 + h2:2 + h2, :] = zrow1

    # conv2 + BN + ReLU, then 2x2 maxpool into the row-padded p2 scratch
    y2 = _conv3x3_banded(p1_ref[...], w2_ref, b2_ref[...])
    p2_ref[0:1, :] = zrow2
    p2_ref[1:1 + h3, :] = _maxpool2x2_mxu(y2, ps2_ref, pr2_ref)
    p2_ref[1 + h3:2 + h3, :] = zrow2

    # conv3 + BN + ReLU, then global-avg-pool + FC (pool scale and the width
    # tiling are folded into wf_ref, so this is a row-sum + one matmul)
    y3 = _conv3x3_banded(p2_ref[...], w3_ref, b3_ref[...])
    ssum = jnp.sum(y3, axis=0, keepdims=True)                   # (1, W3*C3)
    logits = jnp.dot(ssum, wf_ref[...],
                     preferred_element_type=jnp.float32) + bf_ref[...]
    out_ref[0] = logits.astype(out_ref.dtype)


# ------------------------------ JAX wrappers ----------------------------------

def _banded_conv_weights(w_hwio, width, scale):
    """(3,3,Cin,Cout) HWIO conv weights + per-out-channel BN scale ->
    (3*width*Cin, width*Cout) banded matrices (one slab per kh); kw taps and
    the 'same' width zero-padding are folded into the band structure."""
    _, _, cin, cout = w_hwio.shape
    slabs = []
    for kh in range(3):
        band = jnp.zeros((width * cin, width * cout), w_hwio.dtype)
        for kw in range(3):
            sel = jnp.eye(width, width, k=1 - kw, dtype=w_hwio.dtype)
            band = band + jnp.kron(sel, w_hwio[kh, kw])
        slabs.append(band)
    w = jnp.concatenate(slabs, axis=0)
    return w * jnp.tile(scale, width)[None, :]


def _pool_col_selector(width, c, dtype=jnp.float32):
    """(width*c, 2*(width//2)*c) 0/1 matrix: left half picks even width-blocks,
    right half picks odd width-blocks (channel-preserving)."""
    w2 = width // 2
    eye_w2 = jnp.eye(w2, dtype=dtype)
    se = jnp.zeros((width, w2), dtype).at[0::2, :].set(eye_w2)
    so = jnp.zeros((width, w2), dtype).at[1::2, :].set(eye_w2)
    eye_c = jnp.eye(c, dtype=dtype)
    return jnp.concatenate([jnp.kron(se, eye_c), jnp.kron(so, eye_c)], axis=1)


def _pool_row_selector(h, dtype=jnp.float32):
    """(2*(h//2), h) 0/1 matrix: top half picks even rows, bottom half odd rows."""
    h2 = h // 2
    eye_h2 = jnp.eye(h2, dtype=dtype)
    re = jnp.zeros((h2, h), dtype).at[:, 0::2].set(eye_h2)
    ro = jnp.zeros((h2, h), dtype).at[:, 1::2].set(eye_h2)
    return jnp.concatenate([re, ro], axis=0)


def prepare_kernel_params(params, height, width):
    """Precompute (once, outside jit) the kernel-ready weight layout."""
    (w1, s1, b1), (w2, s2, b2), (w3, s3, b3), (wf, bf) = params
    H1, W1 = height, width
    H2, W2 = H1 // 2, W1 // 2
    H3, W3 = H2 // 2, W2 // 2
    return dict(
        w1=_banded_conv_weights(w1, W1, s1), b1=jnp.tile(b1, W1)[None, :],
        ps1=_pool_col_selector(W1, w1.shape[-1]), pr1=_pool_row_selector(H1),
        w2=_banded_conv_weights(w2, W2, s2), b2=jnp.tile(b2, W2)[None, :],
        ps2=_pool_col_selector(W2, w2.shape[-1]), pr2=_pool_row_selector(H2),
        w3=_banded_conv_weights(w3, W3, s3), b3=jnp.tile(b3, W3)[None, :],
        wf=jnp.tile(wf, (W3, 1)) * (1.0 / float(H3 * W3)),   # GAP folded in
        bf=bf[None, :],
    )


def cnn_forward(x, kp):
    """x: (B, H, W) float32 — matches CNN.forward's pre-unsqueeze input."""
    B, H, W = x.shape
    NC = kp["bf"].shape[1]
    C1 = kp["b1"].shape[1] // W
    C2 = kp["b2"].shape[1] // (W // 2)
    xp = jnp.pad(x, ((0, 0), (1, 1), (0, 0)))     # zero-pad rows only (tiny)

    def const2d(a):
        return pl.BlockSpec(a.shape, lambda b: (0, 0))

    out = pl.pallas_call(
        fused_cnn_kernel,
        out_shape=jax.ShapeDtypeStruct((B, 1, NC), jnp.float32),
        grid=(B,),
        in_specs=[
            pl.BlockSpec((1, H + 2, W), lambda b: (b, 0, 0)),
            const2d(kp["w1"]), const2d(kp["b1"]),
            const2d(kp["ps1"]), const2d(kp["pr1"]),
            const2d(kp["w2"]), const2d(kp["b2"]),
            const2d(kp["ps2"]), const2d(kp["pr2"]),
            const2d(kp["w3"]), const2d(kp["b3"]),
            const2d(kp["wf"]), const2d(kp["bf"]),
        ],
        out_specs=pl.BlockSpec((1, 1, NC), lambda b: (b, 0, 0)),
        scratch_shapes=[
            pltpu.VMEM((H // 2 + 2, (W // 2) * C1), jnp.float32),  # pooled1 (row-padded)
            pltpu.VMEM((H // 4 + 2, (W // 4) * C2), jnp.float32),  # pooled2 (row-padded)
        ],
        compiler_params=pltpu.CompilerParams(
            dimension_semantics=("parallel",)),
    )(xp, kp["w1"], kp["b1"], kp["ps1"], kp["pr1"],
      kp["w2"], kp["b2"], kp["ps2"], kp["pr2"],
      kp["w3"], kp["b3"], kp["wf"], kp["bf"])
    return out.reshape(B, NC)


# -------------------------- pure-JAX reference --------------------------------

def reference_forward(x, params):
    (w1, s1, b1), (w2, s2, b2), (w3, s3, b3), (wf, bf) = params
    y = x[..., None]
    for (w, s, b, pool) in [(w1, s1, b1, True), (w2, s2, b2, True), (w3, s3, b3, False)]:
        y = jax.lax.conv_general_dilated(
            y, w, window_strides=(1, 1), padding="SAME",
            dimension_numbers=("NHWC", "HWIO", "NHWC"))
        y = jnp.maximum(y * s + b, 0.0)
        if pool:
            B, H, W, C = y.shape
            y = y.reshape(B, H // 2, 2, W // 2, 2, C).max(axis=(2, 4))
    pooled = y.mean(axis=(1, 2))
    return pooled @ wf + bf


# ------------------------------------ main -------------------------------------

if __name__ == "__main__":
    num_classes = 10
    B, H, W = 2, 16, 16

    key = jax.random.PRNGKey(0)
    keys = jax.random.split(key, 16)
    x = jax.random.normal(keys[0], (B, H, W), jnp.float32)

    def init_conv_bn(kw, kb, kg, kbt, cin, cout, eps=1e-5):
        w = jax.random.normal(kw, (3, 3, cin, cout), jnp.float32) / jnp.sqrt(9.0 * cin)
        conv_b = 0.1 * jax.random.normal(kb, (cout,), jnp.float32)
        gamma = 1.0 + 0.1 * jax.random.normal(kg, (cout,), jnp.float32)
        beta = 0.1 * jax.random.normal(kbt, (cout,), jnp.float32)
        run_mean = jnp.zeros((cout,), jnp.float32)   # PyTorch BN defaults
        run_var = jnp.ones((cout,), jnp.float32)
        scale = gamma / jnp.sqrt(run_var + eps)
        bias = (conv_b - run_mean) * scale + beta     # conv bias folded through BN
        return w, scale, bias

    p1 = init_conv_bn(keys[1], keys[2], keys[3], keys[4], 1, 16)
    p2 = init_conv_bn(keys[5], keys[6], keys[7], keys[8], 16, 32)
    p3 = init_conv_bn(keys[9], keys[10], keys[11], keys[12], 32, 64)
    wf = jax.random.normal(keys[13], (64, num_classes), jnp.float32) / jnp.sqrt(64.0)
    bf = 0.1 * jax.random.normal(keys[14], (num_classes,), jnp.float32)
    params = (p1, p2, p3, (wf, bf))

    kparams = prepare_kernel_params(params, H, W)    # one-time, outside jit

    fwd = jax.jit(cnn_forward)
    out = jax.block_until_ready(fwd(x, kparams))

    ref = jax.block_until_ready(reference_forward(x, params))
    assert out.shape == (B, num_classes), out.shape
    max_err = float(jnp.max(jnp.abs(out - ref)))
    assert max_err < 3e-2, f"max abs error {max_err}"

    print("KERNEL_OK")
</pallas_src>

<mosaic_0001>
module attributes {stable_mosaic.version = 11 : i64} {
  func.func @fused_cnn_kernel(%arg0: i32, %arg1: memref<1x18x16xf32, #tpu.memory_space<vmem>>, %arg2: memref<48x256xf32, #tpu.memory_space<vmem>>, %arg3: memref<1x256xf32, #tpu.memory_space<vmem>>, %arg4: memref<256x256xf32, #tpu.memory_space<vmem>>, %arg5: memref<16x16xf32, #tpu.memory_space<vmem>>, %arg6: memref<384x256xf32, #tpu.memory_space<vmem>>, %arg7: memref<1x256xf32, #tpu.memory_space<vmem>>, %arg8: memref<256x256xf32, #tpu.memory_space<vmem>>, %arg9: memref<8x8xf32, #tpu.memory_space<vmem>>, %arg10: memref<384x256xf32, #tpu.memory_space<vmem>>, %arg11: memref<1x256xf32, #tpu.memory_space<vmem>>, %arg12: memref<256x10xf32, #tpu.memory_space<vmem>>, %arg13: memref<1x10xf32, #tpu.memory_space<vmem>>, %arg14: memref<1x1x10xf32, #tpu.memory_space<vmem>>, %arg15: memref<10x128xf32, #tpu.memory_space<vmem>>, %arg16: memref<6x128xf32, #tpu.memory_space<vmem>>) attributes {dimension_semantics = [#tpu.dimension_semantics<parallel>], iteration_bounds = array<i64: 2>, scalar_prefetch = 0 : i64, scratch_operands = 2 : i64, tpu.core_type = #tpu.core_type<tc>, window_params = [{transform_indices = @transform_0, window_bounds = array<i64: 1, 18, 16>}, {pipeline_mode = #tpu.pipeline_mode<synchronous>, transform_indices = @transform_1, window_bounds = array<i64: 48, 256>}, {pipeline_mode = #tpu.pipeline_mode<synchronous>, transform_indices = @transform_2, window_bounds = array<i64: 1, 256>}, {pipeline_mode = #tpu.pipeline_mode<synchronous>, transform_indices = @transform_3, window_bounds = array<i64: 256, 256>}, {pipeline_mode = #tpu.pipeline_mode<synchronous>, transform_indices = @transform_4, window_bounds = array<i64: 16, 16>}, {pipeline_mode = #tpu.pipeline_mode<synchronous>, transform_indices = @transform_5, window_bounds = array<i64: 384, 256>}, {pipeline_mode = #tpu.pipeline_mode<synchronous>, transform_indices = @transform_6, window_bounds = array<i64: 1, 256>}, {pipeline_mode = #tpu.pipeline_mode<synchronous>, transform_indices = @transform_7, window_bounds = array<i64: 256, 256>}, {pipeline_mode = #tpu.pipeline_mode<synchronous>, transform_indices = @transform_8, window_bounds = array<i64: 8, 8>}, {pipeline_mode = #tpu.pipeline_mode<synchronous>, transform_indices = @transform_9, window_bounds = array<i64: 384, 256>}, {pipeline_mode = #tpu.pipeline_mode<synchronous>, transform_indices = @transform_10, window_bounds = array<i64: 1, 256>}, {pipeline_mode = #tpu.pipeline_mode<synchronous>, transform_indices = @transform_11, window_bounds = array<i64: 256, 10>}, {pipeline_mode = #tpu.pipeline_mode<synchronous>, transform_indices = @transform_12, window_bounds = array<i64: 1, 10>}, {transform_indices = @transform_13, window_bounds = array<i64: 1, 1, 10>}]} {
    %cst = arith.constant 0.000000e+00 : f32
    %0 = vector.broadcast %cst : f32 to vector<1x128xf32>
    %cst_0 = arith.constant 0.000000e+00 : f32
    %1 = vector.broadcast %cst_0 : f32 to vector<1x128xf32>
    %c0 = arith.constant 0 : index
    %c0_1 = arith.constant 0 : index
    %c0_2 = arith.constant 0 : index
    %2 = vector.load %arg1[%c0, %c0_1, %c0_2] : memref<1x18x16xf32, #tpu.memory_space<vmem>>, vector<1x18x16xf32>
    %3 = vector.shape_cast %2 : vector<1x18x16xf32> to vector<18x16xf32>
    %c0_3 = arith.constant 0 : index
    %c0_4 = arith.constant 0 : index
    %4 = vector.load %arg3[%c0_3, %c0_4] : memref<1x256xf32, #tpu.memory_space<vmem>>, vector<1x256xf32>
    %5 = vector.extract_strided_slice %3 {offsets = [0, 0], sizes = [16, 16], strides = [1, 1]} : vector<18x16xf32> to vector<16x16xf32>
    %c0_5 = arith.constant 0 : index
    %c0_6 = arith.constant 0 : index
    %6 = vector.load %arg2[%c0_5, %c0_6] : memref<48x256xf32, #tpu.memory_space<vmem>>, vector<16x256xf32>
    %cst_7 = arith.constant dense<0.000000e+00> : vector<16x256xf32>
    %7 = tpu.matmul %5, %6, %cst_7 {dimension_numbers = #tpu.dot_dimension_numbers<[1], [0], [0], [1], [0, 0, 1, 1], [], []>} : vector<16x16xf32>, vector<16x256xf32>, vector<16x256xf32> -> vector<16x256xf32>
    %8 = vector.extract_strided_slice %3 {offsets = [1, 0], sizes = [16, 16], strides = [1, 1]} : vector<18x16xf32> to vector<16x16xf32>
    %c16 = arith.constant 16 : index
    %c0_8 = arith.constant 0 : index
    %9 = vector.load %arg2[%c16, %c0_8] : memref<48x256xf32, #tpu.memory_space<vmem>>, vector<16x256xf32>
    %cst_9 = arith.constant dense<0.000000e+00> : vector<16x256xf32>
    %10 = tpu.matmul %8, %9, %cst_9 {dimension_numbers = #tpu.dot_dimension_numbers<[1], [0], [0], [1], [0, 0, 1, 1], [], []>} : vector<16x16xf32>, vector<16x256xf32>, vector<16x256xf32> -> vector<16x256xf32>
    %11 = arith.addf %7, %10 : vector<16x256xf32>
    %12 = vector.extract_strided_slice %3 {offsets = [2, 0], sizes = [16, 16], strides = [1, 1]} : vector<18x16xf32> to vector<16x16xf32>
    %c32 = arith.constant 32 : index
    %c0_10 = arith.constant 0 : index
    %13 = vector.load %arg2[%c32, %c0_10] : memref<48x256xf32, #tpu.memory_space<vmem>>, vector<16x256xf32>
    %cst_11 = arith.constant dense<0.000000e+00> : vector<16x256xf32>
    %14 = tpu.matmul %12, %13, %cst_11 {dimension_numbers = #tpu.dot_dimension_numbers<[1], [0], [0], [1], [0, 0, 1, 1], [], []>} : vector<16x16xf32>, vector<16x256xf32>, vector<16x256xf32> -> vector<16x256xf32>
    %15 = arith.addf %11, %14 : vector<16x256xf32>
    %16 = vector.broadcast %4 : vector<1x256xf32> to vector<16x256xf32>
    %17 = arith.addf %15, %16 : vector<16x256xf32>
    %cst_12 = arith.constant 0.000000e+00 : f32
    %18 = vector.broadcast %cst_12 : f32 to vector<16x256xf32>
    %19 = arith.maximumf %17, %18 : vector<16x256xf32>
    %c0_13 = arith.constant 0 : index
    %c0_14 = arith.constant 0 : index
    %20 = vector.load %arg15[%c0_13, %c0_14] : memref<10x128xf32, #tpu.memory_space<vmem>>, vector<1x128xf32>
    tpu.vector_store %arg15[%c0_13, %c0_14], %0 {strides = array<i32>} : memref<10x128xf32, #tpu.memory_space<vmem>>, vector<1x128xf32>,
    %c0_15 = arith.constant 0 : index
    %c0_16 = arith.constant 0 : index
    %21 = vector.load %arg4[%c0_15, %c0_16] : memref<256x256xf32, #tpu.memory_space<vmem>>, vector<256x256xf32>
    %cst_17 = arith.constant dense<0.000000e+00> : vector<16x256xf32>
    %22 = tpu.matmul %19, %21, %cst_17 {dimension_numbers = #tpu.dot_dimension_numbers<[1], [0], [0], [1], [0, 0, 1, 1], [], []>} : vector<16x256xf32>, vector<256x256xf32>, vector<16x256xf32> -> vector<16x256xf32>
    %23 = vector.extract_strided_slice %22 {offsets = [0, 0], sizes = [16, 128], strides = [1, 1]} : vector<16x256xf32> to vector<16x128xf32>
    %24 = vector.extract_strided_slice %22 {offsets = [0, 128], sizes = [16, 128], strides = [1, 1]} : vector<16x256xf32> to vector<16x128xf32>
    %25 = arith.maximumf %23, %24 : vector<16x128xf32>
    %c0_18 = arith.constant 0 : index
    %c0_19 = arith.constant 0 : index
    %26 = vector.load %arg5[%c0_18, %c0_19] : memref<16x16xf32, #tpu.memory_space<vmem>>, vector<16x16xf32>
    %cst_20 = arith.constant dense<0.000000e+00> : vector<16x128xf32>
    %27 = tpu.matmul %26, %25, %cst_20 {dimension_numbers = #tpu.dot_dimension_numbers<[1], [0], [0], [1], [0, 0, 1, 1], [], []>} : vector<16x16xf32>, vector<16x128xf32>, vector<16x128xf32> -> vector<16x128xf32>
    %28 = vector.extract_strided_slice %27 {offsets = [0, 0], sizes = [8, 128], strides = [1, 1]} : vector<16x128xf32> to vector<8x128xf32>
    %29 = vector.extract_strided_slice %27 {offsets = [8, 0], sizes = [8, 128], strides = [1, 1]} : vector<16x128xf32> to vector<8x128xf32>
    %30 = arith.maximumf %28, %29 : vector<8x128xf32>
    %c1 = arith.constant 1 : index
    %c0_21 = arith.constant 0 : index
    %31 = vector.load %arg15[%c1, %c0_21] : memref<10x128xf32, #tpu.memory_space<vmem>>, vector<8x128xf32>
    tpu.vector_store %arg15[%c1, %c0_21], %30 {strides = array<i32>} : memref<10x128xf32, #tpu.memory_space<vmem>>, vector<8x128xf32>,
    %c9 = arith.constant 9 : index
    %c0_22 = arith.constant 0 : index
    %32 = vector.load %arg15[%c9, %c0_22] : memref<10x128xf32, #tpu.memory_space<vmem>>, vector<1x128xf32>
    tpu.vector_store %arg15[%c9, %c0_22], %0 {strides = array<i32>} : memref<10x128xf32, #tpu.memory_space<vmem>>, vector<1x128xf32>,
    %c0_23 = arith.constant 0 : index
    %c0_24 = arith.constant 0 : index
    %33 = vector.load %arg15[%c0_23, %c0_24] : memref<10x128xf32, #tpu.memory_space<vmem>>, vector<10x128xf32>
    %c0_25 = arith.constant 0 : index
    %c0_26 = arith.constant 0 : index
    %34 = vector.load %arg7[%c0_25, %c0_26] : memref<1x256xf32, #tpu.memory_space<vmem>>, vector<1x256xf32>
    %35 = vector.extract_strided_slice %33 {offsets = [0, 0], sizes = [8, 128], strides = [1, 1]} : vector<10x128xf32> to vector<8x128xf32>
    %c0_27 = arith.constant 0 : index
    %c0_28 = arith.constant 0 : index
    %36 = vector.load %arg6[%c0_27, %c0_28] : memref<384x256xf32, #tpu.memory_space<vmem>>, vector<128x256xf32>
    %cst_29 = arith.constant dense<0.000000e+00> : vector<8x256xf32>
    %37 = tpu.matmul %35, %36, %cst_29 {dimension_numbers = #tpu.dot_dimension_numbers<[1], [0], [0], [1], [0, 0, 1, 1], [], []>} : vector<8x128xf32>, vector<128x256xf32>, vector<8x256xf32> -> vector<8x256xf32>
    %38 = vector.extract_strided_slice %33 {offsets = [1, 0], sizes = [8, 128], strides = [1, 1]} : vector<10x128xf32> to vector<8x128xf32>
    %c128 = arith.constant 128 : index
    %c0_30 = arith.constant 0 : index
    %39 = vector.load %arg6[%c128, %c0_30] : memref<384x256xf32, #tpu.memory_space<vmem>>, vector<128x256xf32>
    %cst_31 = arith.constant dense<0.000000e+00> : vector<8x256xf32>
    %40 = tpu.matmul %38, %39, %cst_31 {dimension_numbers = #tpu.dot_dimension_numbers<[1], [0], [0], [1], [0, 0, 1, 1], [], []>} : vector<8x128xf32>, vector<128x256xf32>, vector<8x256xf32> -> vector<8x256xf32>
    %41 = arith.addf %37, %40 : vector<8x256xf32>
    %42 = vector.extract_strided_slice %33 {offsets = [2, 0], sizes = [8, 128], strides = [1, 1]} : vector<10x128xf32> to vector<8x128xf32>
    %c256 = arith.constant 256 : index
    %c0_32 = arith.constant 0 : index
    %43 = vector.load %arg6[%c256, %c0_32] : memref<384x256xf32, #tpu.memory_space<vmem>>, vector<128x256xf32>
    %cst_33 = arith.constant dense<0.000000e+00> : vector<8x256xf32>
    %44 = tpu.matmul %42, %43, %cst_33 {dimension_numbers = #tpu.dot_dimension_numbers<[1], [0], [0], [1], [0, 0, 1, 1], [], []>} : vector<8x128xf32>, vector<128x256xf32>, vector<8x256xf32> -> vector<8x256xf32>
    %45 = arith.addf %41, %44 : vector<8x256xf32>
    %46 = vector.broadcast %34 : vector<1x256xf32> to vector<8x256xf32>
    %47 = arith.addf %45, %46 : vector<8x256xf32>
    %cst_34 = arith.constant 0.000000e+00 : f32
    %48 = vector.broadcast %cst_34 : f32 to vector<8x256xf32>
    %49 = arith.maximumf %47, %48 : vector<8x256xf32>
    %c0_35 = arith.constant 0 : index
    %c0_36 = arith.constant 0 : index
    %50 = vector.load %arg16[%c0_35, %c0_36] : memref<6x128xf32, #tpu.memory_space<vmem>>, vector<1x128xf32>
    tpu.vector_store %arg16[%c0_35, %c0_36], %1 {strides = array<i32>} : memref<6x128xf32, #tpu.memory_space<vmem>>, vector<1x128xf32>,
    %c0_37 = arith.constant 0 : index
    %c0_38 = arith.constant 0 : index
    %51 = vector.load %arg8[%c0_37, %c0_38] : memref<256x256xf32, #tpu.memory_space<vmem>>, vector<256x256xf32>
    %cst_39 = arith.constant dense<0.000000e+00> : vector<8x256xf32>
    %52 = tpu.matmul %49, %51, %cst_39 {dimension_numbers = #tpu.dot_dimension_numbers<[1], [0], [0], [1], [0, 0, 1, 1], [], []>} : vector<8x256xf32>, vector<256x256xf32>, vector<8x256xf32> -> vector<8x256xf32>
    %53 = vector.extract_strided_slice %52 {offsets = [0, 0], sizes = [8, 128], strides = [1, 1]} : vector<8x256xf32> to vector<8x128xf32>
    %54 = vector.extract_strided_slice %52 {offsets = [0, 128], sizes = [8, 128], strides = [1, 1]} : vector<8x256xf32> to vector<8x128xf32>
    %55 = arith.maximumf %53, %54 : vector<8x128xf32>
    %c0_40 = arith.constant 0 : index
    %c0_41 = arith.constant 0 : index
    %56 = vector.load %arg9[%c0_40, %c0_41] : memref<8x8xf32, #tpu.memory_space<vmem>>, vector<8x8xf32>
    %cst_42 = arith.constant dense<0.000000e+00> : vector<8x128xf32>
    %57 = tpu.matmul %56, %55, %cst_42 {dimension_numbers = #tpu.dot_dimension_numbers<[1], [0], [0], [1], [0, 0, 1, 1], [], []>} : vector<8x8xf32>, vector<8x128xf32>, vector<8x128xf32> -> vector<8x128xf32>
    %58 = vector.extract_strided_slice %57 {offsets = [0, 0], sizes = [4, 128], strides = [1, 1]} : vector<8x128xf32> to vector<4x128xf32>
    %59 = vector.extract_strided_slice %57 {offsets = [4, 0], sizes = [4, 128], strides = [1, 1]} : vector<8x128xf32> to vector<4x128xf32>
    %60 = arith.maximumf %58, %59 : vector<4x128xf32>
    %c1_43 = arith.constant 1 : index
    %c0_44 = arith.constant 0 : index
    %61 = vector.load %arg16[%c1_43, %c0_44] : memref<6x128xf32, #tpu.memory_space<vmem>>, vector<4x128xf32>
    tpu.vector_store %arg16[%c1_43, %c0_44], %60 {strides = array<i32>} : memref<6x128xf32, #tpu.memory_space<vmem>>, vector<4x128xf32>,
    %c5 = arith.constant 5 : index
    %c0_45 = arith.constant 0 : index
    %62 = vector.load %arg16[%c5, %c0_45] : memref<6x128xf32, #tpu.memory_space<vmem>>, vector<1x128xf32>
    tpu.vector_store %arg16[%c5, %c0_45], %1 {strides = array<i32>} : memref<6x128xf32, #tpu.memory_space<vmem>>, vector<1x128xf32>,
    %c0_46 = arith.constant 0 : index
    %c0_47 = arith.constant 0 : index
    %63 = vector.load %arg16[%c0_46, %c0_47] : memref<6x128xf32, #tpu.memory_space<vmem>>, vector<6x128xf32>
    %c0_48 = arith.constant 0 : index
    %c0_49 = arith.constant 0 : index
    %64 = vector.load %arg11[%c0_48, %c0_49] : memref<1x256xf32, #tpu.memory_space<vmem>>, vector<1x256xf32>
    %65 = vector.extract_strided_slice %63 {offsets = [0, 0], sizes = [4, 128], strides = [1, 1]} : vector<6x128xf32> to vector<4x128xf32>
    %c0_50 = arith.constant 0 : index
    %c0_51 = arith.constant 0 : index
    %66 = vector.load %arg10[%c0_50, %c0_51] : memref<384x256xf32, #tpu.memory_space<vmem>>, vector<128x256xf32>
    %cst_52 = arith.constant dense<0.000000e+00> : vector<4x256xf32>
    %67 = tpu.matmul %65, %66, %cst_52 {dimension_numbers = #tpu.dot_dimension_numbers<[1], [0], [0], [1], [0, 0, 1, 1], [], []>} : vector<4x128xf32>, vector<128x256xf32>, vector<4x256xf32> -> vector<4x256xf32>
    %68 = vector.extract_strided_slice %63 {offsets = [1, 0], sizes = [4, 128], strides = [1, 1]} : vector<6x128xf32> to vector<4x128xf32>
    %c128_53 = arith.constant 128 : index
    %c0_54 = arith.constant 0 : index
    %69 = vector.load %arg10[%c128_53, %c0_54] : memref<384x256xf32, #tpu.memory_space<vmem>>, vector<128x256xf32>
    %cst_55 = arith.constant dense<0.000000e+00> : vector<4x256xf32>
    %70 = tpu.matmul %68, %69, %cst_55 {dimension_numbers = #tpu.dot_dimension_numbers<[1], [0], [0], [1], [0, 0, 1, 1], [], []>} : vector<4x128xf32>, vector<128x256xf32>, vector<4x256xf32> -> vector<4x256xf32>
    %71 = arith.addf %67, %70 : vector<4x256xf32>
    %72 = vector.extract_strided_slice %63 {offsets = [2, 0], sizes = [4, 128], strides = [1, 1]} : vector<6x128xf32> to vector<4x128xf32>
    %c256_56 = arith.constant 256 : index
    %c0_57 = arith.constant 0 : index
    %73 = vector.load %arg10[%c256_56, %c0_57] : memref<384x256xf32, #tpu.memory_space<vmem>>, vector<128x256xf32>
    %cst_58 = arith.constant dense<0.000000e+00> : vector<4x256xf32>
    %74 = tpu.matmul %72, %73, %cst_58 {dimension_numbers = #tpu.dot_dimension_numbers<[1], [0], [0], [1], [0, 0, 1, 1], [], []>} : vector<4x128xf32>, vector<128x256xf32>, vector<4x256xf32> -> vector<4x256xf32>
    %75 = arith.addf %71, %74 : vector<4x256xf32>
    %76 = vector.broadcast %64 : vector<1x256xf32> to vector<4x256xf32>
    %77 = arith.addf %75, %76 : vector<4x256xf32>
    %cst_59 = arith.constant 0.000000e+00 : f32
    %78 = vector.broadcast %cst_59 : f32 to vector<4x256xf32>
    %79 = arith.maximumf %77, %78 : vector<4x256xf32>
    %cst_60 = arith.constant dense<0.000000e+00> : vector<256xf32>
    %80 = vector.multi_reduction <add>, %79, %cst_60 [0] : vector<4x256xf32> to vector<256xf32>
    %81 = vector.shape_cast %80 : vector<256xf32> to vector<1x256xf32>
    %c0_61 = arith.constant 0 : index
    %c0_62 = arith.constant 0 : index
    %82 = vector.load %arg12[%c0_61, %c0_62] : memref<256x10xf32, #tpu.memory_space<vmem>>, vector<256x10xf32>
    %cst_63 = arith.constant dense<0.000000e+00> : vector<1x10xf32>
    %83 = tpu.matmul %81, %82, %cst_63 {dimension_numbers = #tpu.dot_dimension_numbers<[1], [0], [0], [1], [0, 0, 1, 1], [], []>} : vector<1x256xf32>, vector<256x10xf32>, vector<1x10xf32> -> vector<1x10xf32>
    %c0_64 = arith.constant 0 : index
    %c0_65 = arith.constant 0 : index
    %84 = vector.load %arg13[%c0_64, %c0_65] : memref<1x10xf32, #tpu.memory_space<vmem>>, vector<1x10xf32>
    %85 = arith.addf %83, %84 : vector<1x10xf32>
    %c0_66 = arith.constant 0 : index
    %c0_67 = arith.constant 0 : index
    %c0_68 = arith.constant 0 : index
    %86 = vector.load %arg14[%c0_66, %c0_67, %c0_68] : memref<1x1x10xf32, #tpu.memory_space<vmem>>, vector<1x1x10xf32>
    %87 = vector.shape_cast %86 : vector<1x1x10xf32> to vector<1x10xf32>
    %88 = vector.shape_cast %85 : vector<1x10xf32> to vector<1x1x10xf32>
    tpu.vector_store %arg14[%c0_66, %c0_67, %c0_68], %88 {strides = array<i32>} : memref<1x1x10xf32, #tpu.memory_space<vmem>>, vector<1x1x10xf32>,
    return
  }
  func.func @transform_0(%arg0: i32) -> (i32, i32, i32) {
    %c0_i32 = arith.constant 0 : i32
    %c0_i32_0 = arith.constant 0 : i32
    %c0_i32_1 = arith.constant 0 : i32
    return %arg0, %c0_i32, %c0_i32_0 : i32, i32, i32
  }
  func.func @transform_1(%arg0: i32) -> (i32, i32) {
    %c0_i32 = arith.constant 0 : i32
    %c0_i32_0 = arith.constant 0 : i32
    %c0_i32_1 = arith.constant 0 : i32
    return %c0_i32, %c0_i32_0 : i32, i32
  }
  func.func @transform_2(%arg0: i32) -> (i32, i32) {
    %c0_i32 = arith.constant 0 : i32
    %c0_i32_0 = arith.constant 0 : i32
    %c0_i32_1 = arith.constant 0 : i32
    return %c0_i32, %c0_i32_0 : i32, i32
  }
  func.func @transform_3(%arg0: i32) -> (i32, i32) {
    %c0_i32 = arith.constant 0 : i32
    %c0_i32_0 = arith.constant 0 : i32
    %c0_i32_1 = arith.constant 0 : i32
    return %c0_i32, %c0_i32_0 : i32, i32
  }
  func.func @transform_4(%arg0: i32) -> (i32, i32) {
    %c0_i32 = arith.constant 0 : i32
    %c0_i32_0 = arith.constant 0 : i32
    %c0_i32_1 = arith.constant 0 : i32
    return %c0_i32, %c0_i32_0 : i32, i32
  }
  func.func @transform_5(%arg0: i32) -> (i32, i32) {
    %c0_i32 = arith.constant 0 : i32
    %c0_i32_0 = arith.constant 0 : i32
    %c0_i32_1 = arith.constant 0 : i32
    return %c0_i32, %c0_i32_0 : i32, i32
  }
  func.func @transform_6(%arg0: i32) -> (i32, i32) {
    %c0_i32 = arith.constant 0 : i32
    %c0_i32_0 = arith.constant 0 : i32
    %c0_i32_1 = arith.constant 0 : i32
    return %c0_i32, %c0_i32_0 : i32, i32
  }
  func.func @transform_7(%arg0: i32) -> (i32, i32) {
    %c0_i32 = arith.constant 0 : i32
    %c0_i32_0 = arith.constant 0 : i32
    %c0_i32_1 = arith.constant 0 : i32
    return %c0_i32, %c0_i32_0 : i32, i32
  }
  func.func @transform_8(%arg0: i32) -> (i32, i32) {
    %c0_i32 = arith.constant 0 : i32
    %c0_i32_0 = arith.constant 0 : i32
    %c0_i32_1 = arith.constant 0 : i32
    return %c0_i32, %c0_i32_0 : i32, i32
  }
  func.func @transform_9(%arg0: i32) -> (i32, i32) {
    %c0_i32 = arith.constant 0 : i32
    %c0_i32_0 = arith.constant 0 : i32
    %c0_i32_1 = arith.constant 0 : i32
    return %c0_i32, %c0_i32_0 : i32, i32
  }
  func.func @transform_10(%arg0: i32) -> (i32, i32) {
    %c0_i32 = arith.constant 0 : i32
    %c0_i32_0 = arith.constant 0 : i32
    %c0_i32_1 = arith.constant 0 : i32
    return %c0_i32, %c0_i32_0 : i32, i32
  }
  func.func @transform_11(%arg0: i32) -> (i32, i32) {
    %c0_i32 = arith.constant 0 : i32
    %c0_i32_0 = arith.constant 0 : i32
    %c0_i32_1 = arith.constant 0 : i32
    return %c0_i32, %c0_i32_0 : i32, i32
  }
  func.func @transform_12(%arg0: i32) -> (i32, i32) {
    %c0_i32 = arith.constant 0 : i32
    %c0_i32_0 = arith.constant 0 : i32
    %c0_i32_1 = arith.constant 0 : i32
    return %c0_i32, %c0_i32_0 : i32, i32
  }
  func.func @transform_13(%arg0: i32) -> (i32, i32, i32) {
    %c0_i32 = arith.constant 0 : i32
    %c0_i32_0 = arith.constant 0 : i32
    %c0_i32_1 = arith.constant 0 : i32
    return %arg0, %c0_i32, %c0_i32_0 : i32, i32, i32
  }
}

</mosaic_0001>

<bundles_post_ra>
// kernel: cnn_forward.1
= control target key start
LH: loop header
LB: loop body
LE: loop exit
PB: predicated region body
PF: predicated region fallthrough
CT: control target
= control target key end

     0   :  { %s3415_s0 = inlined_call_operand.vmem [shape: f32[2,18,16], index: 0, kind: input, shape index: {}]   ;;  %s3416_s1 = inlined_call_operand.vmem [shape: f32[48,256], index: 1, kind: input, shape index: {}]   ;;  %s3417_s2 = inlined_call_operand.vmem [shape: f32[1,256], index: 2, kind: input, shape index: {}]   ;;  %s3418_s3 = inlined_call_operand.hbm [shape: f32[256,256], index: 3, kind: input, shape index: {}]   ;;  %s3419_s4 = inlined_call_operand.vmem [shape: f32[16,16], index: 4, kind: input, shape index: {}]   ;;  %s3420_s5 = inlined_call_operand.hbm [shape: f32[384,256], index: 5, kind: input, shape index: {}]   ;;  %s3421_s6 = inlined_call_operand.vmem [shape: f32[1,256], index: 6, kind: input, shape index: {}]   ;;  %s3422_s7 = inlined_call_operand.hbm [shape: f32[256,256], index: 7, kind: input, shape index: {}]   ;;  %s3423_s8 = inlined_call_operand.vmem [shape: f32[8,8], index: 8, kind: input, shape index: {}]   ;;  %s3424_s9 = inlined_call_operand.hbm [shape: f32[384,256], index: 9, kind: input, shape index: {}]   ;;  %s3425_s10 = inlined_call_operand.vmem [shape: f32[1,256], index: 10, kind: input, shape index: {}]   ;;  %s3426_s11 = inlined_call_operand.vmem [shape: f32[256,10], index: 11, kind: input, shape index: {}]   ;;  %s3427_s12 = inlined_call_operand.vmem [shape: f32[1,10], index: 12, kind: input, shape index: {}]   ;;  %s3428_s13 = inlined_call_operand.hbm [shape: f32[2,1,10], index: 13, kind: output, shape index: {}]  }
   0x1   :  { %3441 = sst [smem:[#allocation24_spill]] %s3427_s12 }
   0x2   :  { %3442 = sst [smem:[#allocation25_spill]] %s3428_s13 }
   0x3   :  { %18 = vsyncpa [#allocation5], 0 }
   0x4   :  { %19 = vsyncpa [#allocation8], 0 }
   0x5   :  { %20 = vsyncpa [#allocation11], 0 }
   0x6   :  { %21 = vsyncpa [#allocation6], 0 }
   0x7   :  { %23 = vsyncpa [#allocation6 + $0x1], 0  ;;  %s2958_s25 = smov 0   ;;  %s2960_s26 = smov 0  }
   0x8   :  { %s2962_s27 = smov 0   ;;  %s2964_s28 = smov 0  }
   0x9 LB: > { %3443 = sst [smem:[#allocation17_spill]] %s2865_s25  ;;  %s2979_s29 = sadd.s32 4294967295, %s2877_s28   ;;  %s2877_s28 = sphi %s2964_s28, %s3470_s28   ;;  %s2873_s27 = sphi %s2962_s27, %s3472_s27   ;;  %s2869_s26 = sphi %s2960_s26, %s3474_s26   ;;  %s2865_s25 = sphi %s2958_s25, %s3473_s25  }
   0xa   : > { %3444 = sst [smem:[#allocation18_spill]] %s2873_s27  ;;  %s2144_s30 = sadd.s32 4294967294, %s2877_s28  }
   0xb   : > { %3445 = sst [smem:[#allocation19_spill]] %s2877_s28  ;;  %s2983_s14 = sadd.s32 1, %s2877_s28  }
   0xc   : > { %3446 = sst [smem:[#allocation20_spill]] %s2983_s14  ;;  %s314_s15 = sadd.s32 1, %s2873_s27 }
   0xd   : > { %s311_s16 = ssub.s32 %s2877_s28, %s2983_s14  ;;  %p324_p0 = scmp.ne.s32.totalorder %s2873_s27, %s2869_s26 }
   0xe   : > { %p312_p1 = scmp.eq.s32.totalorder %s311_s16, 0  ;;  %p325_p2 = scmp.eq.s32.totalorder %s2979_s29, 1 }
   0xf   : > { %p330_p3 = scmp.ne.s32.totalorder %s2869_s26, %s2865_s25  ;;  %p331_p4 = scmp.eq.s32.totalorder %s2144_s30, 1 }
  0x10   : > { %s2994_s17 = scalar_select %p312_p1, %s2873_s27, %s314_s15  }
  0x11   : > { %p2996_p5 = por %p325_p2, %p324_p0  ;;  %p3000_p6 = por %p331_p4, %p330_p3 }
  0x12   : > { %3447 = sst [smem:[#allocation21_spill]] %s2994_s17  ;;  %p2145_p7 = scmp.ge.s32.totalorder %s2877_s28, 1 }
  0x13   : > { %s3448_s18 = scalar_select %p2996_p5, 1, 0 }
  0x14   : > { %s3450_s19 = scalar_select %p3000_p6, 1, 0 }
  0x15   : > { %3449 = sst [smem:[#allocation22_spill]] %s3448_s18  ;;  %p338_p8 = scmp.lt.s32.totalorder %s2877_s28, 3 }
  0x16   : > { %3451 = sst [smem:[#allocation23_spill]] %s3450_s19  ;;  %p3434_p9 = scmp.eq.s32.totalorder %s2979_s29, 0 }
  0x17   : > { %p3007_p10 = pnand %p2145_p7, %p338_p8  ;;  %s2879_s21 = smov [#allocation7]  }
  0x18   : > { %s372_s22 = sshll.u32 %s2879_s21, 4  ;;  %s2880_s24 = smov [#allocation4]   ;;  %s3013_s22 = int_to_ptr.vmem [resolvable:$true] %s372_s22 }
  0x19   : > { %s3452_s20 = scalar_select %p3007_p10, 1, 0 }
  0x1a   : > { %p2625_p11 = pneg %p3007_p10  ;;  %s356_s30 = sshll.u32 %s2880_s24, 4  ;;  %s3021_s30 = int_to_ptr.vmem [resolvable:$true] %s356_s30 }
  0x1b   : > { %s2881_s15 = smov [#allocation9]   ;;  %s2691_s14 = scalar_lea.hbm %s3420_s5, 12288 }
  0x1c   : > { %p3017_p12 = pnand %p3434_p9, %p2625_p11  ;;  %s3023_s16 = sshll.u32 %s2881_s15, 4  ;;  %s389_s16 = int_to_ptr.vmem [resolvable:$true] %s3023_s16 }
  0x1d   : > { %p2692_p13 = scmp.ne.s32.totalorder %s3420_s5, %s2691_s14  ;;  %p2698_p3 = scmp.lt.u32.totalorder %s2691_s14, %s3420_s5 }
  0x1e   : > { %p3033_p0 = pneg %p3017_p12 }
  0x20   : > { %p2694_p1 = pnand %p3033_p0, %p2692_p13 }
  0x22   : > { %p2695_p2 = pneg %p2694_p1 }
  0x24   : > { %p2700_p4 = pnand %p2698_p3, %p2695_p2 }
  0x26   : > { %2703 = shalt.err (!%p2700_p4)
}
  0x27   : > { %s2704_s27 = scalar_lea.vmem %s3013_s22, 12288  ;;  %p2712_p9 = scmp.lt.s32.totalorder %s3013_s22, %s3013_s22 }
  0x28   : > { %p2705_p7 = scmp.ne.s32.totalorder %s3013_s22, %s2704_s27  ;;  %p2713_p6 = scmp.lt.s32.totalorder %s2704_s27, %s2704_s27 }
  0x2a   : > { %p2707_p8 = pnand %p2705_p7, %p3033_p0  ;;  %p2714_p13 = por %p2713_p6, %p2712_p9 }
  0x2c   : > { %p2708_p11 = pneg %p2707_p8 }
  0x2e   : > { %p2715_p1 = pnand %p2714_p13, %p2708_p11 }
  0x30   : > { %2718 = shalt.err (!%p2715_p1)
}
  0x31   : > { %s2882_s17 = smov 256   ;;  %s2883_s14 = smov 16  }
  0x32   : > { %2631 = dma.hbm_to_vmem [thread:$0]  (!%p3017_p12), %s3420_s5, 12288, %s3013_s22, [#allocation8], %s2882_s17, %s2882_s17, %s2883_s14  }
  0x33   : > { %s2719_s27 = scalar_lea.hbm %s3418_s3, 8192 }
  0x34   : > { %p2720_p6 = scmp.ne.s32.totalorder %s3418_s3, %s2719_s27  ;;  %p2726_p3 = scmp.lt.u32.totalorder %s2719_s27, %s3418_s3 }
  0x36   : > { %p2722_p9 = pnand %p2720_p6, %p3033_p0 }
  0x38   : > { %p2723_p2 = pneg %p2722_p9 }
  0x3a   : > { %p2728_p4 = pnand %p2726_p3, %p2723_p2 }
  0x3c   : > { %2731 = shalt.err (!%p2728_p4)
}
  0x3d   : > { %s2732_s22 = scalar_lea.vmem %s3021_s30, 8192  ;;  %p2740_p13 = scmp.lt.s32.totalorder %s3021_s30, %s3021_s30 }
  0x3e   : > { %p2733_p7 = scmp.ne.s32.totalorder %s3021_s30, %s2732_s22  ;;  %p2741_p1 = scmp.lt.s32.totalorder %s2732_s22, %s2732_s22 }
  0x40   : > { %p2735_p8 = pnand %p2733_p7, %p3033_p0  ;;  %p2742_p6 = por %p2741_p1, %p2740_p13 }
  0x42   : > { %p2736_p11 = pneg %p2735_p8 }
  0x44   : > { %p2743_p9 = pnand %p2742_p6, %p2736_p11 }
  0x46   : > { %2746 = shalt.err (!%p2743_p9)
}
  0x47   : > { %2628 = dma.hbm_to_vmem [thread:$0]  (!%p3017_p12), %s3418_s3, 8192, %s3021_s30, [#allocation5], %s2882_s17, %s2882_s17, %s2883_s14  }
  0x48   : > { %s2747_s19 = scalar_lea.hbm %s3422_s7, 8192 }
  0x49   : > { %p2748_p2 = scmp.ne.s32.totalorder %s3422_s7, %s2747_s19  ;;  %p2754_p7 = scmp.lt.u32.totalorder %s2747_s19, %s3422_s7 }
  0x4b   : > { %p2750_p3 = pnand %p2748_p2, %p3033_p0 }
  0x4d   : > { %p2751_p4 = pneg %p2750_p3 }
  0x4f   : > { %p2756_p8 = pnand %p2754_p7, %p2751_p4 }
  0x51   : > { %2759 = shalt.err (!%p2756_p8)
}
  0x52   : > { %s2760_s22 = scalar_lea.vmem %s389_s16, 8192  ;;  %p2768_p6 = scmp.lt.s32.totalorder %s389_s16, %s389_s16 }
  0x53   : > { %p2761_p11 = scmp.ne.s32.totalorder %s389_s16, %s2760_s22  ;;  %p2769_p9 = scmp.lt.s32.totalorder %s2760_s22, %s2760_s22 }
  0x55   : > { %p2763_p13 = pnand %p2761_p11, %p3033_p0  ;;  %p2770_p5 = por %p2769_p9, %p2768_p6 }
  0x57   : > { %p2764_p1 = pneg %p2763_p13 }
  0x59   : > { %p2771_p10 = pnand %p2770_p5, %p2764_p1 }
  0x5b   : > { %2774 = shalt.err (!%p2771_p10)
}
  0x5c   : > { %2634 = dma.hbm_to_vmem [thread:$0]  (!%p3017_p12), %s3422_s7, 8192, %s389_s16, [#allocation8], %s2882_s17, %s2882_s17, %s2883_s14  }
  0x5d   : > { %s2884_s13 = smov [#allocation10]   ;;  %s2775_s21 = scalar_lea.hbm %s3424_s9, 12288 }
  0x5e   : > { %s404_s28 = sshll.u32 %s2884_s13, 4  ;;  %p2776_p5 = scmp.ne.s32.totalorder %s3424_s9, %s2775_s21  ;;  %s405_s28 = int_to_ptr.vmem [resolvable:$true] %s404_s28 }
  0x5f   : > { %p2782_p3 = scmp.lt.u32.totalorder %s2775_s21, %s3424_s9 }
  0x60   : > { %p2778_p10 = pnand %p2776_p5, %p3033_p0 }
  0x62   : > { %p2779_p2 = pneg %p2778_p10 }
  0x64   : > { %p2784_p4 = pnand %p2782_p3, %p2779_p2 }
  0x66   : > { %2787 = shalt.err (!%p2784_p4)
}
  0x67   : > { %s2788_s16 = scalar_lea.vmem %s405_s28, 12288  ;;  %p2796_p13 = scmp.lt.s32.totalorder %s405_s28, %s405_s28 }
  0x68   : > { %p2789_p7 = scmp.ne.s32.totalorder %s405_s28, %s2788_s16  ;;  %p2797_p1 = scmp.lt.s32.totalorder %s2788_s16, %s2788_s16 }
  0x6a   : > { %p2791_p8 = pnand %p2789_p7, %p3033_p0  ;;  %p2798_p6 = por %p2797_p1, %p2796_p13 }
  0x6c   : > { %p2792_p11 = pneg %p2791_p8 }
  0x6e   : > { %p2799_p9 = pnand %p2798_p6, %p2792_p11 }
  0x70   : > { %2802 = shalt.err (!%p2799_p9)
}
  0x71   : > { %2637 = dma.hbm_to_vmem [thread:$0]  (!%p3017_p12), %s3424_s9, 12288, %s405_s28, [#allocation11], %s2882_s17, %s2882_s17, %s2883_s14  }
  0x72   : > { %p3455_p5 = scmp.ne.s32.totalorder %s3452_s20, 0 }
  0x73   : > { %p3456_p0 = scmp.eq.s32.totalorder (!%p3455_p5), %s2979_s29, 0 }
  0x74   : > { %437 = sbr.rel (%p3455_p5) target bundleno = 2043 (0x7fb), region = 72 }
  0x7b   : > { %2848 = dma.done.wait (%p3456_p0), [#allocation5], 8192   ;;  %p3457_p10 = pmov %p3456_p0 }
  0x7c   : > { %p3458_p2 = pmov %p3456_p0 }
  0x7d   : > { %2850 = vsyncadd (%p3457_p10), [#allocation5], 4294959104 }
  0x7e   : > { %2852 = dma.done.wait (%p3458_p2), [#allocation8], 20480   ;;  %p3459_p3 = pmov %p3456_p0 }
  0x7f   : > { %p3460_p4 = pmov %p3456_p0 }
  0x80   : > { %2854 = vsyncadd (%p3459_p3), [#allocation8], 4294946816 }
  0x81   : > { %2856 = dma.done.wait (%p3460_p4), [#allocation11], 12288   ;;  %p3461_p12 = pmov %p3456_p0 }
  0x82   : > { %p492_p7 = scmp.lt.s32.totalorder %s2979_s29, 1  ;;  %v2885_v0 = vmov 0.0   ;;  %v506_v1 = vld [vmem:[%s3416_s1 + $0x28] sm:$0xff]  ;;  %v508_v2 = vld [vmem:[%s3416_s1 + $0x38] sm:$0xff]  ;;  %v505_v3 = vld [vmem:[%s3416_s1 + $0x20] sm:$0xff]  ;;  %vm512_vm0 = vcmask 1046528  }
  0x83   : > { %2858 = vsyncadd (%p3461_p12), [#allocation11], 4294955008  ;;  %587 = vmatprep.mubr.f32.mxu0 %v2885_v0  ;;  %795 = vst [vmem:[#allocation2] sm:$0x1] %v2885_v0  ;;  %v2222_v4 = vpack.c.bf16 %v508_v2, %v506_v1  ;;  %v507_v5 = vld [vmem:[%s3416_s1 + $0x30] sm:$0xff]  ;;  %v502_v12 = vld [vmem:[%s3416_s1 + $0x8] sm:$0xff] }
  0x84   : > { %1024 = vst [vmem:[#allocation2 + $0x9] sm:$0x1] %v2885_v0  ;;  %1364 = vst [vmem:[#allocation3] sm:$0x1] %v2885_v0  ;;  %s493_s25 = scalar_select %p492_p7, %s2979_s29, 1  ;;  %v2224_v8 = vpack.c.bf16 %v507_v5, %v505_v3  ;;  %vm518_vm1 = vcmask 130048  }
  0x85   : > { %1581 = vst [vmem:[#allocation3 + $0x5] sm:$0x1] %v2885_v0  ;;  %2223 = vmatprep.subr.bf16.mxu0 %v2222_v4  ;;  %v504_v13 = vld [vmem:[%s3416_s1 + $0x18] sm:$0xff]  ;;  %v501_v14 = vld [vmem:[%s3416_s1] sm:$0xff]  ;;  %v503_v15 = vld [vmem:[%s3416_s1 + $0x10] sm:$0xff]  ;;  %vm685_vm2 = vcmask 1045504  }
  0x86   : > { %s2606_s20 = smul.u32 24, %s493_s25  ;;  %2225 = vmatpush1.bf16.msra.mxu0 %v2224_v8  ;;  %v2226_v18 = vpack.c.bf16 %v504_v13, %v502_v12  ;;  %v2228_v19 = vpack.c.bf16 %v503_v15, %v501_v14  ;;  %v682_v20 = vld [vmem:[%s3416_s1 + $0x48] sm:$0xff]  ;;  %v684_v21 = vld [vmem:[%s3416_s1 + $0x58] sm:$0xff]  ;;  %v797_v23 = vld [vmem:[#allocation4 + $0x8] sm:$0xff]  ;;  %vm2886_vm3 = vmmov 0   ;;  %vm1502_vm4 = vcmask 64512  }
  0x87   : > { %v2230_v22 = vpack.c.bf16 %v684_v21, %v682_v20  ;;  %v799_v24 = vld [vmem:[#allocation4 + $0x18] sm:$0xff]  ;;  %v796_v26 = vld [vmem:[#allocation4] sm:$0xff]  ;;  %v798_v27 = vld [vmem:[#allocation4 + $0x10] sm:$0xff]  ;;  %vm1915_vm5 = vcmask 1043456   ;;  %s490_s17 = sand.u32 1, %s2869_s26   ;;  %s3463_s18 = sld [smem:[#allocation24_spill]] }
  0x88   : > { %s496_s14 = scalar_lea.vmem %s3415_s0, %s2606_s20  ;;  %2227 = vmatprep.subr.bf16.mxu0 %v2226_v18  ;;  %v2234_v25 = vpack.c.bf16 %v799_v24, %v797_v23  ;;  %v801_v28 = vld [vmem:[#allocation4 + $0x28] sm:$0xff]  ;;  %v2236_v29 = vpack.c.bf16 %v798_v27, %v796_v26  ;;  %v803_v30 = vld [vmem:[#allocation4 + $0x38] sm:$0xff]  ;;  %v800_v31 = vld [vmem:[#allocation4 + $0x20] sm:$0xff]  ;;  %s2166_s19 = sshll.u32 %s2979_s29, 4  ;;  %vm2033_vm6 = vcmask 73728  }
  0x89   : > { %v3162_v6 = vld [vmem:[%s496_s14] sm:$0xff]  ;;  %v3164_v7 = vld [vmem:[%s496_s14 + $0x8] sm:$0xff]  ;;  %v3168_v11 = vld [vmem:[%s496_s14 + $0x10] sm:$0x3]  ;;  %v2238_v34 = vpack.c.bf16 %v803_v30, %v801_v28  ;;  %s3462_s14 = sld [smem:[#allocation22_spill]]  ;;  %s491_s21 = scalar_lea.vmem [#allocation12], %s490_s17 }
  0x8a   : > { %v513_v9 = vrot.slane %v3162_v6, 1  ;;  %v514_v10 = vrot.slane %v3164_v7, 1  ;;  %v516_v17 = vrot.slane %v3168_v11, 1  ;;  %v802_v32 = vld [vmem:[#allocation4 + $0x30] sm:$0xff]  ;;  %v805_v35 = vld [vmem:[#allocation4 + $0x48] sm:$0xff]  ;;  %v807_v36 = vld [vmem:[#allocation4 + $0x58] sm:$0xff]  ;;  %2235 = vmatprep.subr.bf16.mxu1 %v2234_v25 }
  0x8b   : > { %v681_v37 = vld [vmem:[%s3416_s1 + $0x40] sm:$0xff]  ;;  %v683_v38 = vld [vmem:[%s3416_s1 + $0x50] sm:$0xff]  ;;  %2237 = vmatpush1.bf16.msra.mxu1 %v2236_v29  ;;  %v2240_v39 = vpack.c.bf16 %v802_v32, %v800_v31  ;;  %v2242_v40 = vpack.c.bf16 %v807_v36, %v805_v35  ;;  %v804_v41 = vld [vmem:[#allocation4 + $0x40] sm:$0xff]  ;;  %v686_v50 = vrot.slane %v3162_v6, 2  ;;  %v687_v51 = vrot.slane %v3164_v7, 2  ;;  %s2048_s24 = sshll.u32 %s491_s21, 4  ;;  %s3375_s24 = int_to_ptr.vmem [resolvable:$true] %s2048_s24 }
  0x8c   : > { %v515_v16 = vsel %vm512_vm0, %v513_v9, %v514_v10  ;;  %v517_v33 = vsel %vm512_vm0, %v514_v10, %v516_v17  ;;  %2239 = vmatprep.subr.bf16.mxu1 %v2238_v34  ;;  %v806_v42 = vld [vmem:[#allocation4 + $0x50] sm:$0xff]  ;;  %v2232_v43 = vpack.c.bf16 %v683_v38, %v681_v37  ;;  %v809_v44 = vld [vmem:[#allocation4 + $0x68] sm:$0xff]  ;;  %v811_v45 = vld [vmem:[#allocation4 + $0x78] sm:$0xff]  ;;  %v689_v59 = vrot.slane %v3168_v11, 2  ;;  %s3464_s22 = sld [smem:[#allocation25_spill]]  ;;  %s2036_s30 = scalar_lea.sflag [#allocation6], %s490_s17 }
  0x8d   : > { %2157 = vmatmul.mubr.msk.f32.vlgmr.msra.gmra.mrb[0].mxu0 %vm518_vm1, %v515_v16  ;;  %v2244_v46 = vpack.c.bf16 %v806_v42, %v804_v41  ;;  %v2246_v47 = vpack.c.bf16 %v811_v45, %v809_v44  ;;  %v808_v48 = vld [vmem:[#allocation4 + $0x60] sm:$0xff]  ;;  %v810_v49 = vld [vmem:[#allocation4 + $0x70] sm:$0xff]  ;;  %v813_v52 = vld [vmem:[#allocation4 + $0x88] sm:$0xff]  ;;  %v688_v58 = vsel %vm685_vm2, %v686_v50, %v687_v51  ;;  %s2803_s12 = scalar_lea.vmem %s3375_s24, 16  ;;  %s2887_s29 = smov [#allocation12]  }
  0x8e   : > { %593 = vmatprep.mubr.f32.mxu0 %v2885_v0  ;;  %2229 = vmatpush1.bf16.msra.mxu0 %v2228_v19  ;;  %v815_v53 = vld [vmem:[#allocation4 + $0x98] sm:$0xff]  ;;  %v2248_v54 = vpack.c.bf16 %v810_v49, %v808_v48  ;;  %v812_v56 = vld [vmem:[#allocation4 + $0x80] sm:$0xff]  ;;  %v814_v57 = vld [vmem:[#allocation4 + $0x90] sm:$0xff]  ;;  %v690_v3 = vsel %vm685_vm2, %v687_v51, %v689_v59  ;;  %p2804_p8 = scmp.ne.s32.totalorder %s3375_s24, %s2803_s12  ;;  %s2807_s25 = sshll.u32 %s2887_s29, 4  ;;  %s2808_s25 = int_to_ptr.vmem [resolvable:$false] %s2807_s25 }
  0x8f   : > { %2231 = vmatprep.subr.bf16.mxu0 %v2230_v22  ;;  %2241 = vmatpush1.bf16.msra.mxu1 %v2240_v39  ;;  %v2250_v55 = vpack.c.bf16 %v815_v53, %v813_v52  ;;  %v817_v60 = vld [vmem:[#allocation4 + $0xa8] sm:$0xff]  ;;  %v819_v61 = vld [vmem:[#allocation4 + $0xb8] sm:$0xff]  ;;  %v2252_v62 = vpack.c.bf16 %v814_v57, %v812_v56  ;;  %v816_v1 = vld [vmem:[#allocation4 + $0xa0] sm:$0xff]  ;;  %p3465_p11 = scmp.ne.s32.totalorder %s3462_s14, 0  ;;  %s2809_s20 = scalar_lea.vmem %s2808_s25, 32 }
  0x90   : > { %2243 = vmatprep.subr.bf16.mxu1 %v2242_v40  ;;  %v2254_v63 = vpack.c.bf16 %v819_v61, %v817_v60  ;;  %v818_v2 = vld [vmem:[#allocation4 + $0xb0] sm:$0xff]  ;;  %v821_v4 = vld [vmem:[#allocation4 + $0xc8] sm:$0xff]  ;;  %v823_v5 = vld [vmem:[#allocation4 + $0xd8] sm:$0xff]  ;;  %p2810_p6 = scmp.lt.s32.totalorder %s3375_s24, %s2808_s25  ;;  %p2811_p9 = scmp.lt.s32.totalorder %s2809_s20, %s2803_s12 }
  0x91   : > { %2158 = vmatmul.mubr.msk.f32.gmra.mrb[2].mxu0 %vm518_vm1, %v517_v33  ;;  %v820_v8 = vld [vmem:[#allocation4 + $0xc0] sm:$0xff]  ;;  %v822_v9 = vld [vmem:[#allocation4 + $0xd0] sm:$0xff]  ;;  %v825_v10 = vld [vmem:[#allocation4 + $0xe8] sm:$0xff]  ;;  %p2805_p13 = pnand %p2804_p8, %p3465_p11 }
  0x92   : > { %668 = vmatprep.mubr.f32.mxu0 %v2885_v0  ;;  %v827_v11 = vld [vmem:[#allocation4 + $0xf8] sm:$0xff]  ;;  %v2260_v12 = vpack.c.bf16 %v822_v9, %v820_v8  ;;  %v824_v14 = vld [vmem:[#allocation4 + $0xe0] sm:$0xff]  ;;  %v826_v15 = vld [vmem:[#allocation4 + $0xf0] sm:$0xff]  ;;  %s3373_s16 = scalar_lea.hbm %s3464_s22, %s2166_s19  ;;  %p2812_p5 = por %p2811_p9, %p2810_p6 }
  0x93   : > { %2245 = vmatpush1.bf16.msra.mxu1 %v2244_v46  ;;  %v2262_v13 = vpack.c.bf16 %v827_v11, %v825_v10  ;;  %v829_v16 = vld [vmem:[#allocation4 + $0x108] sm:$0xff]  ;;  %v831_v17 = vld [vmem:[#allocation4 + $0x118] sm:$0xff]  ;;  %v2264_v18 = vpack.c.bf16 %v826_v15, %v824_v14  ;;  %v828_v20 = vld [vmem:[#allocation4 + $0x100] sm:$0xff]  ;;  %p2806_p1 = pneg %p2805_p13 }
  0x94   : > { %2247 = vmatprep.subr.bf16.mxu1 %v2246_v47  ;;  %v2266_v19 = vpack.c.bf16 %v831_v17, %v829_v16  ;;  %v830_v21 = vld [vmem:[#allocation4 + $0x110] sm:$0xff]  ;;  %v833_v22 = vld [vmem:[#allocation4 + $0x128] sm:$0xff]  ;;  %v835_v23 = vld [vmem:[#allocation4 + $0x138] sm:$0xff] }
  0x95   : > { %2159 = vmatmul.mubr.msk.f32.vlgmr.msra.gmra.mrb[0].mxu0 %vm518_vm1, %v3162_v6  ;;  %v2256_v6 = vpack.c.bf16 %v818_v2, %v816_v1  ;;  %v2268_v24 = vpack.c.bf16 %v830_v21, %v828_v20  ;;  %v2270_v25 = vpack.c.bf16 %v835_v23, %v833_v22  ;;  %v832_v26 = vld [vmem:[#allocation4 + $0x120] sm:$0xff]  ;;  %v834_v27 = vld [vmem:[#allocation4 + $0x130] sm:$0xff]  ;;  %v837_v28 = vld [vmem:[#allocation4 + $0x148] sm:$0xff]  ;;  %v777_v2 = vlaneseq  ;;  %p2813_p0 = pnand %p2812_p5, %p2806_p1 }
  0x96   : > { %674 = vmatprep.mubr.f32.mxu0 %v2885_v0  ;;  %2233 = vmatpush1.bf16.msra.mxu0 %v2232_v43  ;;  %v839_v29 = vld [vmem:[#allocation4 + $0x158] sm:$0xff]  ;;  %v2272_v30 = vpack.c.bf16 %v834_v27, %v832_v26  ;;  %v836_v32 = vld [vmem:[#allocation4 + $0x140] sm:$0xff]  ;;  %v838_v33 = vld [vmem:[#allocation4 + $0x150] sm:$0xff] }
  0x97   : > { %2249 = vmatpush1.bf16.msra.mxu1 %v2248_v54  ;;  %v2274_v31 = vpack.c.bf16 %v839_v29, %v837_v28  ;;  %v841_v34 = vld [vmem:[#allocation4 + $0x168] sm:$0xff]  ;;  %v843_v35 = vld [vmem:[#allocation4 + $0x178] sm:$0xff]  ;;  %v2276_v36 = vpack.c.bf16 %v838_v33, %v836_v32  ;;  %v840_v38 = vld [vmem:[#allocation4 + $0x160] sm:$0xff] }
  0x98   : > { %2251 = vmatprep.subr.bf16.mxu1 %v2250_v55  ;;  %v2278_v37 = vpack.c.bf16 %v843_v35, %v841_v34  ;;  %v842_v39 = vld [vmem:[#allocation4 + $0x170] sm:$0xff]  ;;  %v845_v40 = vld [vmem:[#allocation4 + $0x188] sm:$0xff]  ;;  %v847_v41 = vld [vmem:[#allocation4 + $0x198] sm:$0xff] }
  0x99   : > { %2160 = vmatmul.mubr.msk.f32.gmra.mrb[2].mxu0 %vm518_vm1, %v3164_v7  ;;  %v2258_v7 = vpack.c.bf16 %v823_v5, %v821_v4  ;;  %v2280_v42 = vpack.c.bf16 %v842_v39, %v840_v38  ;;  %v2282_v43 = vpack.c.bf16 %v847_v41, %v845_v40  ;;  %v844_v44 = vld [vmem:[#allocation4 + $0x180] sm:$0xff]  ;;  %v846_v45 = vld [vmem:[#allocation4 + $0x190] sm:$0xff]  ;;  %v849_v46 = vld [vmem:[#allocation4 + $0x1a8] sm:$0xff] }
  0x9a   : > { %759 = vmatprep.mubr.f32.mxu0 %v2885_v0  ;;  %v851_v47 = vld [vmem:[#allocation4 + $0x1b8] sm:$0xff]  ;;  %v2284_v48 = vpack.c.bf16 %v846_v45, %v844_v44  ;;  %v848_v50 = vld [vmem:[#allocation4 + $0x1a0] sm:$0xff]  ;;  %v850_v51 = vld [vmem:[#allocation4 + $0x1b0] sm:$0xff] }
  0x9b   : > { %2253 = vmatpush1.bf16.msra.mxu1 %v2252_v62  ;;  %v2286_v49 = vpack.c.bf16 %v851_v47, %v849_v46  ;;  %v853_v52 = vld [vmem:[#allocation4 + $0x1c8] sm:$0xff]  ;;  %v855_v53 = vld [vmem:[#allocation4 + $0x1d8] sm:$0xff]  ;;  %v2288_v54 = vpack.c.bf16 %v850_v51, %v848_v50  ;;  %v852_v56 = vld [vmem:[#allocation4 + $0x1c0] sm:$0xff] }
  0x9c   : > { %2255 = vmatprep.subr.bf16.mxu1 %v2254_v63  ;;  %v2290_v55 = vpack.c.bf16 %v855_v53, %v853_v52  ;;  %v854_v57 = vld [vmem:[#allocation4 + $0x1d0] sm:$0xff]  ;;  %v857_v59 = vld [vmem:[#allocation4 + $0x1e8] sm:$0xff]  ;;  %v859_v60 = vld [vmem:[#allocation4 + $0x1f8] sm:$0xff] }
  0x9d   : > { %2161 = vmatmul.mubr.msk.f32.vlgmr.msra.gmra.mrb[0].mxu0 %vm518_vm1, %v688_v58  ;;  %v2292_v58 = vpack.c.bf16 %v854_v57, %v852_v56  ;;  %v2294_v61 = vpack.c.bf16 %v859_v60, %v857_v59  ;;  %v856_v62 = vld [vmem:[#allocation4 + $0x1e0] sm:$0xff]  ;;  %v858_v63 = vld [vmem:[#allocation4 + $0x1f0] sm:$0xff]  ;;  %v500_v5 = vld [vmem:[%s3417_s2] sm:$0x3] }
  0x9e   : > { %765 = vmatprep.mubr.f32.mxu0 %v2885_v0  ;;  %v2296_v1 = vpack.c.bf16 %v858_v63, %v856_v62  ;;  %v939_v21 = vld [vmem:[%s3419_s4] sm:$0xff]  ;;  %v1063_v23 = vld [vmem:[#allocation7 + $0x118] sm:$0xff]  ;;  %v1062_v26 = vld [vmem:[#allocation7 + $0x110] sm:$0xff] }
  0x9f   : > { %2257 = vmatpush1.bf16.msra.mxu1 %v2256_v6  ;;  %v1061_v22 = vld [vmem:[#allocation7 + $0x108] sm:$0xff]  ;;  %v1067_v29 = vld [vmem:[#allocation7 + $0x138] sm:$0xff]  ;;  %v1066_v32 = vld [vmem:[#allocation7 + $0x130] sm:$0xff] }
  0xa0   : > { %2259 = vmatprep.subr.bf16.mxu1 %v2258_v7  ;;  %v1065_v28 = vld [vmem:[#allocation7 + $0x128] sm:$0xff]  ;;  %v1071_v35 = vld [vmem:[#allocation7 + $0x158] sm:$0xff]  ;;  %v1070_v38 = vld [vmem:[#allocation7 + $0x150] sm:$0xff] }
  0xa1   : > { %2162 = vmatmul.mubr.msk.f32.gmra.mrb[2].mxu0 %vm518_vm1, %v690_v3  ;;  %v778_v3 = vshrl.u32 %v777_v2, 7  ;;  %v1069_v34 = vld [vmem:[#allocation7 + $0x148] sm:$0xff]  ;;  %v1075_v41 = vld [vmem:[#allocation7 + $0x178] sm:$0xff]  ;;  %v1074_v44 = vld [vmem:[#allocation7 + $0x170] sm:$0xff] }
  0xa2   : > { %2214 = vmatprep.mubr.msk.f32.mxu0 %vm518_vm1, %v939_v21  ;;  %v1073_v40 = vld [vmem:[#allocation7 + $0x168] sm:$0xff]  ;;  %v1079_v47 = vld [vmem:[#allocation7 + $0x198] sm:$0xff]  ;;  %v1028_v59 = vld [vmem:[#allocation7] sm:$0xff] }
  0xa3   : > { %2261 = vmatpush1.bf16.msra.mxu1 %v2260_v12  ;;  %v3215_v4 = vsub.s32 0, %v778_v3  ;;  %v3220_v6 = vsub.s32 1, %v778_v3  ;;  %v1077_v46 = vld [vmem:[#allocation7 + $0x188] sm:$0xff]  ;;  %v1030_v60 = vld [vmem:[#allocation7 + $0x10] sm:$0xff]  ;;  %v1035_v62 = vld [vmem:[#allocation7 + $0x38] sm:$0xff] }
  0xa4   : > { %2263 = vmatprep.subr.bf16.mxu1 %v2262_v13  ;;  %v940_v63 = vld [vmem:[%s3419_s4 + $0x8] sm:$0xff]  ;;  %v1032_v3 = vld [vmem:[#allocation7 + $0x20] sm:$0xff] }
  0xa5   : > { %v780_v7 = vrot.slane %v500_v5, %v3215_v4  ;;  %v784_v8 = vrot.slane %v500_v5, %v3220_v6  ;;  %v1034_v5 = vld [vmem:[#allocation7 + $0x30] sm:$0xff] }
  0xa7   : > { %2265 = vmatpush1.bf16.msra.mxu1 %v2264_v18 }
  0xa8   : > { %2267 = vmatprep.subr.bf16.mxu1 %v2266_v19 }
  0xab   : > { %2269 = vmatpush1.bf16.msra.mxu1 %v2268_v24  ;;  %v2302_v24 = vpack.c.bf16 %v1063_v23, %v1061_v22  ;;  %v1044_v23 = vld [vmem:[#allocation7 + $0x80] sm:$0xff] }
  0xac   : > { %2271 = vmatprep.subr.bf16.mxu1 %v2270_v25  ;;  %v1060_v25 = vld [vmem:[#allocation7 + $0x100] sm:$0xff] }
  0xad   : > { %v2304_v27 = vpack.c.bf16 %v1062_v26, %v1060_v25  ;;  %v1049_v25 = vld [vmem:[#allocation7 + $0xa8] sm:$0xff]  ;;  %v1051_v26 = vld [vmem:[#allocation7 + $0xb8] sm:$0xff] }
  0xaf   : > { %2273 = vmatpush1.bf16.msra.mxu1 %v2272_v30  ;;  %v2306_v30 = vpack.c.bf16 %v1067_v29, %v1065_v28  ;;  %v2354_v28 = vpack.c.bf16 %v1051_v26, %v1049_v25  ;;  %v1076_v29 = vld [vmem:[#allocation7 + $0x180] sm:$0xff]  ;;  %v1372_v25 = vld [vmem:[#allocation9 + $0x38] sm:$0xff] }
  0xb0   : > { %2275 = vmatprep.subr.bf16.mxu1 %v2274_v31  ;;  %v1064_v31 = vld [vmem:[#allocation7 + $0x120] sm:$0xff] }
  0xb1   : > { %v2308_v33 = vpack.c.bf16 %v1066_v32, %v1064_v31  ;;  %v1048_v31 = vld [vmem:[#allocation7 + $0xa0] sm:$0xff] }
  0xb3   : > { %2277 = vmatpush1.bf16.msra.mxu1 %v2276_v36  ;;  %v2310_v36 = vpack.c.bf16 %v1071_v35, %v1069_v34  ;;  %v1081_v35 = vld [vmem:[#allocation7 + $0x1a8] sm:$0xff] }
  0xb4   : > { %2279 = vmatprep.subr.bf16.mxu1 %v2278_v37  ;;  %v1068_v37 = vld [vmem:[#allocation7 + $0x140] sm:$0xff] }
  0xb5   : > { %v2312_v39 = vpack.c.bf16 %v1070_v38, %v1068_v37  ;;  %v1053_v37 = vld [vmem:[#allocation7 + $0xc8] sm:$0xff] }
  0xb7   : > { %2281 = vmatpush1.bf16.msra.mxu1 %v2280_v42  ;;  %v2314_v42 = vpack.c.bf16 %v1075_v41, %v1073_v40  ;;  %v1080_v40 = vld [vmem:[#allocation7 + $0x1a0] sm:$0xff]  ;;  %v1082_v41 = vld [vmem:[#allocation7 + $0x1b0] sm:$0xff] }
  0xb8   : > { %2283 = vmatprep.subr.bf16.mxu1 %v2282_v43  ;;  %v1072_v43 = vld [vmem:[#allocation7 + $0x160] sm:$0xff] }
  0xb9   : > { %v2316_v45 = vpack.c.bf16 %v1074_v44, %v1072_v43  ;;  %v2324_v43 = vpack.c.bf16 %v1082_v41, %v1080_v40  ;;  %v1052_v44 = vld [vmem:[#allocation7 + $0xc0] sm:$0xff]  ;;  %v1374_v40 = vld [vmem:[#allocation9 + $0x48] sm:$0xff]  ;;  %v1376_v41 = vld [vmem:[#allocation9 + $0x58] sm:$0xff] }
  0xbb   : > { %2285 = vmatpush1.bf16.msra.mxu1 %v2284_v48  ;;  %v2318_v48 = vpack.c.bf16 %v1079_v47, %v1077_v46  ;;  %v1085_v47 = vld [vmem:[#allocation7 + $0x1c8] sm:$0xff] }
  0xbc   : > { %2287 = vmatprep.subr.bf16.mxu1 %v2286_v49 }
  0xbf   : > { %2289 = vmatpush1.bf16.msra.mxu1 %v2288_v54  ;;  %v1029_v54 = vld [vmem:[#allocation7 + $0x8] sm:$0xff] }
  0xc0   : > { %2291 = vmatprep.subr.bf16.mxu1 %v2290_v55  ;;  %v1031_v55 = vld [vmem:[#allocation7 + $0x18] sm:$0xff] }
  0xc3   : > { %2293 = vmatpush1.bf16.msra.mxu1 %v2292_v58  ;;  %v2334_v58 = vpack.c.bf16 %v1031_v55, %v1029_v54 }
  0xc4   : > { %2295 = vmatprep.subr.bf16.mxu1 %v2294_v61  ;;  %v1033_v61 = vld [vmem:[#allocation7 + $0x28] sm:$0xff] }
  0xc5   : > { %v2338_v2 = vpack.c.bf16 %v1035_v62, %v1033_v61  ;;  %v1241_v61 = vld [vmem:[#allocation7 + $0x208] sm:$0xff]  ;;  %v1243_v62 = vld [vmem:[#allocation7 + $0x218] sm:$0xff] }
  0xc7   : > { %2297 = vmatpush1.bf16.msra.mxu1 %v2296_v1  ;;  %v2336_v1 = vpack.c.bf16 %v1030_v60, %v1028_v59  ;;  %v1091_v60 = vld [vmem:[#allocation7 + $0x1f8] sm:$0xff] }
  0xc8   : > { %2303 = vmatprep.subr.bf16.mxu1 %v2302_v24  ;;  %v1046_v24 = vld [vmem:[#allocation7 + $0x90] sm:$0xff] }
 0x170   : > { %v761_v9 = vpop.f32.mrb[0].mxu0 }
 0x171   : > { %v787_v10 = vadd.f32 %v780_v7, %v761_v9  ;;  %v763_v11 = vpop.f32.mrb[1].mxu0  ;;  %v2340_v9 = vpack.c.bf16 %v1034_v5, %v1032_v3  ;;  %v1090_v3 = vld [vmem:[#allocation7 + $0x1f0] sm:$0xff] }
 0x172   : > { %v788_v12 = vadd.f32 %v784_v8, %v763_v11  ;;  %v1036_v11 = vld [vmem:[#allocation7 + $0x40] sm:$0xff] }
 0x173   : > { %v791_v15 = vmax.f32 %v787_v10, 0.0 }
 0x174   : > { %v767_v13 = vpop.f32.mrb[2].mxu0  ;;  %v792_v14 = vmax.f32 %v788_v12, 0.0  ;;  %v1038_v12 = vld [vmem:[#allocation7 + $0x50] sm:$0xff] }
 0x175   : > { %v789_v16 = vadd.f32 %v780_v7, %v767_v13  ;;  %v769_v17 = vpop.f32.mrb[3].mxu0  ;;  %v1037_v7 = vld [vmem:[#allocation7 + $0x48] sm:$0xff] }
 0x176   : > { %v790_v18 = vadd.f32 %v784_v8, %v769_v17  ;;  %924 = vmatprep.mubr.f32.mxu1 %v792_v14  ;;  %v1039_v8 = vld [vmem:[#allocation7 + $0x58] sm:$0xff]  ;;  %v1041_v13 = vld [vmem:[#allocation7 + $0x68] sm:$0xff]  ;;  %v1040_v17 = vld [vmem:[#allocation7 + $0x60] sm:$0xff] }
 0x177   : > { %925 = vmatmul.mubr.f32.vlgmr.msra.gmra.mrb[0].mxu1 %v791_v15  ;;  %v793_v20 = vmax.f32 %v789_v16, 0.0  ;;  %v2342_v10 = vpack.c.bf16 %v1039_v8, %v1037_v7  ;;  %v1043_v14 = vld [vmem:[#allocation7 + $0x78] sm:$0xff]  ;;  %v2344_v15 = vpack.c.bf16 %v1038_v12, %v1036_v11  ;;  %v1366_v7 = vld [vmem:[#allocation9 + $0x8] sm:$0xff] }
 0x178   : > { %v794_v19 = vmax.f32 %v790_v18, 0.0  ;;  %2305 = vmatpush1.bf16.msra.mxu1 %v2304_v27  ;;  %v2346_v16 = vpack.c.bf16 %v1043_v14, %v1041_v13  ;;  %v1042_v18 = vld [vmem:[#allocation7 + $0x70] sm:$0xff]  ;;  %v2352_v27 = vpack.c.bf16 %v1046_v24, %v1044_v23  ;;  %v1368_v8 = vld [vmem:[#allocation9 + $0x18] sm:$0xff]  ;;  %v1240_v13 = vld [vmem:[#allocation7 + $0x200] sm:$0xff] }
 0x179   : > { %2307 = vmatprep.subr.bf16.mxu1 %v2306_v30  ;;  %v2348_v21 = vpack.c.bf16 %v1042_v18, %v1040_v17  ;;  %v1078_v30 = vld [vmem:[#allocation7 + $0x190] sm:$0xff]  ;;  %v1244_v17 = vld [vmem:[#allocation7 + $0x220] sm:$0xff]  ;;  %v1249_v23 = vld [vmem:[#allocation7 + $0x248] sm:$0xff] }
 0x17a   : > { %930 = vmatprep.mubr.f32.mxu1 %v794_v19  ;;  %v1045_v19 = vld [vmem:[#allocation7 + $0x88] sm:$0xff]  ;;  %v2320_v32 = vpack.c.bf16 %v1078_v30, %v1076_v29  ;;  %v1242_v14 = vld [vmem:[#allocation7 + $0x210] sm:$0xff] }
 0x17b   : > { %931 = vmatmul.mubr.f32.gmra.mrb[2].mxu1 %v793_v20  ;;  %v1047_v20 = vld [vmem:[#allocation7 + $0x98] sm:$0xff]  ;;  %v2368_v18 = vpack.c.bf16 %v1242_v14, %v1240_v13  ;;  %v1370_v24 = vld [vmem:[#allocation9 + $0x28] sm:$0xff]  ;;  %v1262_v14 = vld [vmem:[#allocation7 + $0x2b0] sm:$0xff] }
 0x17c   : > { %1162 = vmatprep.mubr.f32.mxu1 %v2885_v0  ;;  %2309 = vmatpush1.bf16.msra.mxu1 %v2308_v33  ;;  %v2350_v22 = vpack.c.bf16 %v1047_v20, %v1045_v19  ;;  %v1050_v33 = vld [vmem:[#allocation7 + $0xb0] sm:$0xff]  ;;  %v1365_v20 = vld [vmem:[#allocation9] sm:$0xff] }
 0x17d   : > { %2311 = vmatprep.subr.bf16.mxu1 %v2310_v36  ;;  %v2356_v34 = vpack.c.bf16 %v1050_v33, %v1048_v31  ;;  %v1083_v36 = vld [vmem:[#allocation7 + $0x1b8] sm:$0xff]  ;;  %v1246_v19 = vld [vmem:[#allocation7 + $0x230] sm:$0xff]  ;;  %v1248_v33 = vld [vmem:[#allocation7 + $0x240] sm:$0xff] }
 0x17e   : > { %v2322_v38 = vpack.c.bf16 %v1083_v36, %v1081_v35  ;;  %v1369_v35 = vld [vmem:[#allocation9 + $0x20] sm:$0xff]  ;;  %v1371_v36 = vld [vmem:[#allocation9 + $0x30] sm:$0xff] }
 0x180   : > { %2313 = vmatpush1.bf16.msra.mxu1 %v2312_v39  ;;  %v1055_v39 = vld [vmem:[#allocation7 + $0xd8] sm:$0xff] }
 0x181   : > { %2315 = vmatprep.subr.bf16.mxu1 %v2314_v42  ;;  %v2358_v42 = vpack.c.bf16 %v1055_v39, %v1053_v37  ;;  %v1250_v39 = vld [vmem:[#allocation7 + $0x250] sm:$0xff] }
 0x184   : > { %2317 = vmatpush1.bf16.msra.mxu1 %v2316_v45  ;;  %v1054_v45 = vld [vmem:[#allocation7 + $0xd0] sm:$0xff] }
 0x185   : > { %2319 = vmatprep.subr.bf16.mxu1 %v2318_v48  ;;  %v2360_v46 = vpack.c.bf16 %v1054_v45, %v1052_v44  ;;  %v1087_v48 = vld [vmem:[#allocation7 + $0x1d8] sm:$0xff]  ;;  %v2404_v44 = vpack.c.bf16 %v1371_v36, %v1369_v35  ;;  %v2376_v45 = vpack.c.bf16 %v1250_v39, %v1248_v33  ;;  %v1389_v36 = vld [vmem:[#allocation9 + $0xc0] sm:$0xff] }
 0x186   : > { %v1268_v39 = vld [vmem:[#allocation7 + $0x2e0] sm:$0xff] }
 0x188   : > { %2321 = vmatpush1.bf16.msra.mxu1 %v2320_v32  ;;  %v2372_v32 = vpack.c.bf16 %v1246_v19, %v1244_v17  ;;  %v1265_v17 = vld [vmem:[#allocation7 + $0x2c8] sm:$0xff] }
 0x189   : > { %2323 = vmatprep.subr.bf16.mxu1 %v2322_v38 }
 0x18c   : > { %2325 = vmatpush1.bf16.msra.mxu1 %v2324_v43  ;;  %v1255_v43 = vld [vmem:[#allocation7 + $0x278] sm:$0xff] }
 0x24a   : > { %v926_v49 = vpop.f32.mrb[0].mxu1 }
 0x24b   : > { %v928_v50 = vpop.f32.mrb[1].mxu1 }
 0x24c   : > { %v937_v51 = vmax.f32 %v926_v49, %v928_v50  ;;  %v1057_v49 = vld [vmem:[#allocation7 + $0xe8] sm:$0xff]  ;;  %v2326_v50 = vpack.c.bf16 %v1087_v48, %v1085_v47  ;;  %v2406_v47 = vpack.c.bf16 %v1376_v41, %v1374_v40  ;;  %v1373_v48 = vld [vmem:[#allocation9 + $0x40] sm:$0xff]  ;;  %v1270_v40 = vld [vmem:[#allocation7 + $0x2f0] sm:$0xff] }
 0x24e   : > { %v932_v52 = vpop.f32.mrb[2].mxu1  ;;  %2327 = vmatprep.subr.bf16.mxu1 %v2326_v50 }
 0x24f   : > { %v934_v53 = vpop.f32.mrb[3].mxu1 }
 0x250   : > { %v938_v56 = vmax.f32 %v932_v52, %v934_v53  ;;  %v1084_v52 = vld [vmem:[#allocation7 + $0x1c0] sm:$0xff]  ;;  %v1086_v53 = vld [vmem:[#allocation7 + $0x1d0] sm:$0xff] }
 0x251   : > { %v2328_v55 = vpack.c.bf16 %v1086_v53, %v1084_v52  ;;  %v1378_v52 = vld [vmem:[#allocation9 + $0x68] sm:$0xff]  ;;  %v1380_v53 = vld [vmem:[#allocation9 + $0x78] sm:$0xff] }
 0x252   : > { %v2298_v57 = vpack.c.bf16 %v938_v56, %v937_v51  ;;  %v1059_v51 = vld [vmem:[#allocation7 + $0xf8] sm:$0xff]  ;;  %v1056_v56 = vld [vmem:[#allocation7 + $0xe0] sm:$0xff] }
 0x253   : > { %v2362_v54 = vpack.c.bf16 %v1059_v51, %v1057_v49  ;;  %2329 = vmatpush1.bf16.msra.mxu1 %v2328_v55  ;;  %v1375_v49 = vld [vmem:[#allocation9 + $0x50] sm:$0xff]  ;;  %v1259_v55 = vld [vmem:[#allocation7 + $0x298] sm:$0xff] }
 0x254   : > { %2299 = vmatprep.subr.bf16.mxu0 %v2298_v57  ;;  %v1254_v51 = vld [vmem:[#allocation7 + $0x270] sm:$0xff] }
 0x255   : > { %2301 = vmatpush3.bf16.msra.mxu0 %v2298_v57  ;;  %v1058_v57 = vld [vmem:[#allocation7 + $0xf0] sm:$0xff] }
 0x256   : > { %2335 = vmatprep.subr.bf16.mxu0 %v2334_v58  ;;  %v1089_v58 = vld [vmem:[#allocation7 + $0x1e8] sm:$0xff]  ;;  %v2364_v59 = vpack.c.bf16 %v1058_v57, %v1056_v56  ;;  %v2408_v56 = vpack.c.bf16 %v1375_v49, %v1373_v48  ;;  %v1393_v49 = vld [vmem:[#allocation9 + $0xe0] sm:$0xff] }
 0x258   : > { %2215 = vmatmul.mubr.msk.f32.vlgmr.msra.gmra.mrb[4].mxu0 %vm518_vm1, %v940_v63  ;;  %v2330_v63 = vpack.c.bf16 %v1091_v60, %v1089_v58  ;;  %v1256_v58 = vld [vmem:[#allocation7 + $0x280] sm:$0xff] }
 0x259   : > { %2337 = vmatpush1.bf16.msra.mxu0 %v2336_v1  ;;  %1233 = vmatprep.mubr.f32.mxu0 %v2885_v0  ;;  %v2366_v1 = vpack.c.bf16 %v1243_v62, %v1241_v61  ;;  %v1377_v60 = vld [vmem:[#allocation9 + $0x60] sm:$0xff]  ;;  %v1379_v61 = vld [vmem:[#allocation9 + $0x70] sm:$0xff] }
 0x25a   : > { %2339 = vmatprep.subr.bf16.mxu0 %v2338_v2  ;;  %v1088_v2 = vld [vmem:[#allocation7 + $0x1e0] sm:$0xff]  ;;  %2331 = vmatprep.subr.bf16.mxu1 %v2330_v63  ;;  %v1258_v63 = vld [vmem:[#allocation7 + $0x290] sm:$0xff] }
 0x25b   : > { %v2332_v5 = vpack.c.bf16 %v1090_v3, %v1088_v2  ;;  %v1384_v2 = vld [vmem:[#allocation9 + $0x98] sm:$0xff]  ;;  %v1261_v3 = vld [vmem:[#allocation7 + $0x2a8] sm:$0xff] }
 0x25d   : > { %2341 = vmatpush1.bf16.msra.mxu0 %v2340_v9  ;;  %2333 = vmatpush1.bf16.msra.mxu1 %v2332_v5  ;;  %v2398_v9 = vpack.c.bf16 %v1368_v8, %v1366_v7  ;;  %v1263_v5 = vld [vmem:[#allocation7 + $0x2b8] sm:$0xff]  ;;  %v2412_v7 = vpack.c.bf16 %v1379_v61, %v1377_v60  ;;  %v2384_v8 = vpack.c.bf16 %v1258_v63, %v1256_v58  ;;  %v1403_v60 = vld [vmem:[#allocation9 + $0x130] sm:$0xff]  ;;  %v1406_v61 = vld [vmem:[#allocation9 + $0x148] sm:$0xff] }
 0x25e   : > { %2343 = vmatprep.subr.bf16.mxu0 %v2342_v10  ;;  %v2386_v13 = vpack.c.bf16 %v1263_v5, %v1261_v3  ;;  %v1407_v3 = vld [vmem:[#allocation9 + $0x150] sm:$0xff]  ;;  %v1410_v5 = vld [vmem:[#allocation9 + $0x168] sm:$0xff] }
 0x25f   : > { %2399 = vmatprep.subr.bf16.mxu1 %v2398_v9  ;;  %v1260_v9 = vld [vmem:[#allocation7 + $0x2a0] sm:$0xff] }
 0x261   : > { %2345 = vmatpush1.bf16.msra.mxu0 %v2344_v15  ;;  %v1245_v15 = vld [vmem:[#allocation7 + $0x228] sm:$0xff] }
 0x262   : > { %2347 = vmatprep.subr.bf16.mxu0 %v2346_v16  ;;  %v1247_v16 = vld [vmem:[#allocation7 + $0x238] sm:$0xff] }
 0x265   : > { %2349 = vmatpush1.bf16.msra.mxu0 %v2348_v21  ;;  %v1367_v21 = vld [vmem:[#allocation9 + $0x10] sm:$0xff] }
 0x266   : > { %2351 = vmatprep.subr.bf16.mxu0 %v2350_v22  ;;  %v2370_v22 = vpack.c.bf16 %v1247_v16, %v1245_v15  ;;  %v2400_v31 = vpack.c.bf16 %v1367_v21, %v1365_v20  ;;  %v1386_v15 = vld [vmem:[#allocation9 + $0xa8] sm:$0xff]  ;;  %v1388_v16 = vld [vmem:[#allocation9 + $0xb8] sm:$0xff]  ;;  %v2388_v20 = vpack.c.bf16 %v1262_v14, %v1260_v9  ;;  %v1264_v21 = vld [vmem:[#allocation7 + $0x2c0] sm:$0xff] }
 0x269   : > { %2353 = vmatpush1.bf16.msra.mxu0 %v2352_v27 }
 0x26a   : > { %2355 = vmatprep.subr.bf16.mxu0 %v2354_v28  ;;  %v1251_v28 = vld [vmem:[#allocation7 + $0x258] sm:$0xff] }
 0x26b   : > { %v2374_v38 = vpack.c.bf16 %v1251_v28, %v1249_v23  ;;  %v1385_v23 = vld [vmem:[#allocation9 + $0xa0] sm:$0xff]  ;;  %v1266_v28 = vld [vmem:[#allocation7 + $0x2d0] sm:$0xff] }
 0x26d   : > { %2357 = vmatpush1.bf16.msra.mxu0 %v2356_v34  ;;  %v2402_v34 = vpack.c.bf16 %v1372_v25, %v1370_v24  ;;  %v1387_v24 = vld [vmem:[#allocation9 + $0xb0] sm:$0xff] }
 0x26e   : > { %2359 = vmatprep.subr.bf16.mxu0 %v2358_v42  ;;  %v1253_v42 = vld [vmem:[#allocation7 + $0x268] sm:$0xff]  ;;  %v2420_v33 = vpack.c.bf16 %v1387_v24, %v1385_v23  ;;  %v1419_v23 = vld [vmem:[#allocation9 + $0x1b0] sm:$0xff] }
 0x26f   : > { %v2378_v50 = vpack.c.bf16 %v1255_v43, %v1253_v42  ;;  %v2396_v42 = vpack.c.bf16 %v1270_v40, %v1268_v39 }
 0x271   : > { %2361 = vmatpush1.bf16.msra.mxu0 %v2360_v46  ;;  %v1252_v46 = vld [vmem:[#allocation7 + $0x260] sm:$0xff] }
 0x272   : > { %2363 = vmatprep.subr.bf16.mxu0 %v2362_v54  ;;  %v1257_v54 = vld [vmem:[#allocation7 + $0x288] sm:$0xff]  ;;  %v2380_v57 = vpack.c.bf16 %v1254_v51, %v1252_v46 }
 0x273   : > { %v2382_v62 = vpack.c.bf16 %v1259_v55, %v1257_v54  ;;  %v1394_v46 = vld [vmem:[#allocation9 + $0xe8] sm:$0xff]  ;;  %v1397_v54 = vld [vmem:[#allocation9 + $0x100] sm:$0xff]  ;;  %v1399_v55 = vld [vmem:[#allocation9 + $0x110] sm:$0xff] }
 0x275   : > { %2365 = vmatpush1.bf16.msra.mxu0 %v2364_v59  ;;  %v2410_v59 = vpack.c.bf16 %v1380_v53, %v1378_v52  ;;  %v1398_v52 = vld [vmem:[#allocation9 + $0x108] sm:$0xff]  ;;  %v1400_v53 = vld [vmem:[#allocation9 + $0x118] sm:$0xff] }
 0x276   : > { %2367 = vmatprep.subr.bf16.mxu0 %v2366_v1  ;;  %v1382_v1 = vld [vmem:[#allocation9 + $0x88] sm:$0xff] }
 0x32b   : > { %v2216_v10 = vpop.f32.mrb[4].mxu0 }
 0x32c   : > { %v1013_v11 = vpop.f32.mrb[5].mxu0 }
 0x32d   : > { %v1022_v12 = vmax.f32 %v1013_v11, %v2216_v10  ;;  %v2414_v10 = vpack.c.bf16 %v1384_v2, %v1382_v1  ;;  %v1381_v11 = vld [vmem:[#allocation9 + $0x80] sm:$0xff] }
 0x32e   : > { %v1405_v2 = vld [vmem:[#allocation9 + $0x140] sm:$0xff] }
 0x32f   : > { %1023 = vst [vmem:[#allocation2 + $0x1] sm:$0xff] %v1022_v12  ;;  %v1383_v12 = vld [vmem:[#allocation9 + $0x90] sm:$0xff] }
 0x330   : > { %v2416_v19 = vpack.c.bf16 %v1383_v12, %v1381_v11  ;;  %v1411_v11 = vld [vmem:[#allocation9 + $0x170] sm:$0xff]  ;;  %v1414_v12 = vld [vmem:[#allocation9 + $0x188] sm:$0xff] }
 0x336   : > { %v3234_v26 = vld [vmem:[#allocation2] sm:$0xff]  ;;  %v3236_v27 = vld [vmem:[#allocation2 + $0x8] sm:$0x3] }
 0x337   : > { %v1094_v29 = vrot.slane %v3234_v26, 1  ;;  %1234 = vmatmul.mubr.f32.vlgmr.msra.gmra.mrb[6].mxu0 %v3234_v26  ;;  %v1095_v30 = vrot.slane %v3236_v27, 1  ;;  %v1272_v43 = vrot.slane %v3234_v26, 2  ;;  %v2430_v26 = vpack.c.bf16 %v1400_v53, %v1398_v52  ;;  %v1617_v52 = vld [vmem:[#allocation10 + $0x108] sm:$0xff]  ;;  %v1619_v53 = vld [vmem:[#allocation10 + $0x118] sm:$0xff] }
 0x338   : > { %2369 = vmatpush1.bf16.msra.mxu0 %v2368_v18  ;;  %1340 = vmatprep.mubr.f32.mxu0 %v2885_v0  ;;  %v1267_v18 = vld [vmem:[#allocation7 + $0x2d8] sm:$0xff] }
 0x339   : > { %v1096_v37 = vsel %vm512_vm0, %v1094_v29, %v1095_v30  ;;  %2371 = vmatprep.subr.bf16.mxu0 %v2370_v22  ;;  %v2418_v22 = vpack.c.bf16 %v1388_v16, %v1386_v15  ;;  %v2390_v25 = vpack.c.bf16 %v1267_v18, %v1265_v17  ;;  %v1390_v29 = vld [vmem:[#allocation9 + $0xc8] sm:$0xff]  ;;  %v1392_v30 = vld [vmem:[#allocation9 + $0xd8] sm:$0xff]  ;;  %v1413_v16 = vld [vmem:[#allocation9 + $0x180] sm:$0xff] }
 0x33a   : > { %1163 = vmatmul.mubr.f32.vlgmr.msra.gmra.mrb[4].mxu1 %v1096_v37  ;;  %v2422_v35 = vpack.c.bf16 %v1392_v30, %v1390_v29  ;;  %v1391_v37 = vld [vmem:[#allocation9 + $0xd0] sm:$0xff]  ;;  %v1418_v18 = vld [vmem:[#allocation9 + $0x1a8] sm:$0xff]  ;;  %v1421_v30 = vld [vmem:[#allocation9 + $0x1c0] sm:$0xff] }
 0x33b   : > { %2401 = vmatpush1.bf16.msra.mxu1 %v2400_v31  ;;  %v1269_v31 = vld [vmem:[#allocation7 + $0x2e8] sm:$0xff]  ;;  %v2424_v41 = vpack.c.bf16 %v1391_v37, %v1389_v36  ;;  %v1415_v17 = vld [vmem:[#allocation9 + $0x190] sm:$0xff]  ;;  %v1425_v36 = vld [vmem:[#allocation9 + $0x1e0] sm:$0xff] }
 0x33c   : > { %2373 = vmatpush1.bf16.msra.mxu0 %v2372_v32  ;;  %2403 = vmatprep.subr.bf16.mxu1 %v2402_v34  ;;  %v1271_v32 = vld [vmem:[#allocation7 + $0x2f8] sm:$0xff]  ;;  %v2392_v34 = vpack.c.bf16 %v1266_v28, %v1264_v21  ;;  %v1427_v37 = vld [vmem:[#allocation9 + $0x1f0] sm:$0xff] }
 0x33d   : > { %2375 = vmatprep.subr.bf16.mxu0 %v2374_v38  ;;  %v2394_v38 = vpack.c.bf16 %v1271_v32, %v1269_v31  ;;  %v1424_v28 = vld [vmem:[#allocation9 + $0x1d8] sm:$0xff]  ;;  %v1423_v31 = vld [vmem:[#allocation9 + $0x1d0] sm:$0xff] }
 0x33e   : > { %v2456_v32 = vpack.c.bf16 %v1423_v31, %v1421_v30  ;;  %v1641_v31 = vld [vmem:[#allocation10 + $0x1c8] sm:$0xff] }
 0x33f   : > { %2405 = vmatpush1.bf16.msra.mxu1 %v2404_v44  ;;  %v1273_v44 = vrot.slane %v3236_v27, 2  ;;  %v1402_v27 = vld [vmem:[#allocation9 + $0x128] sm:$0xff] }
 0x340   : > { %2377 = vmatpush1.bf16.msra.mxu0 %v2376_v45  ;;  %2407 = vmatprep.subr.bf16.mxu1 %v2406_v47  ;;  %v1396_v47 = vld [vmem:[#allocation9 + $0xf8] sm:$0xff] }
 0x341   : > { %2379 = vmatprep.subr.bf16.mxu0 %v2378_v50  ;;  %v1274_v45 = vsel %vm685_vm2, %v1272_v43, %v1273_v44  ;;  %v2426_v48 = vpack.c.bf16 %v1396_v47, %v1394_v46  ;;  %v1395_v50 = vld [vmem:[#allocation9 + $0xf0] sm:$0xff] }
 0x342   : > { %v2428_v51 = vpack.c.bf16 %v1395_v50, %v1393_v49 }
 0x343   : > { %2409 = vmatpush1.bf16.msra.mxu1 %v2408_v56  ;;  %v1404_v56 = vld [vmem:[#allocation9 + $0x138] sm:$0xff] }
 0x344   : > { %2381 = vmatpush1.bf16.msra.mxu0 %v2380_v57  ;;  %2411 = vmatprep.subr.bf16.mxu1 %v2410_v59  ;;  %v2432_v57 = vpack.c.bf16 %v1399_v55, %v1397_v54  ;;  %v2434_v58 = vpack.c.bf16 %v1404_v56, %v1402_v27  ;;  %v1401_v59 = vld [vmem:[#allocation9 + $0x120] sm:$0xff]  ;;  %v1621_v27 = vld [vmem:[#allocation10 + $0x128] sm:$0xff]  ;;  %v1623_v56 = vld [vmem:[#allocation10 + $0x138] sm:$0xff] }
 0x345   : > { %2383 = vmatprep.subr.bf16.mxu0 %v2382_v62  ;;  %v1408_v62 = vld [vmem:[#allocation9 + $0x158] sm:$0xff]  ;;  %v2436_v63 = vpack.c.bf16 %v1403_v60, %v1401_v59  ;;  %v1616_v54 = vld [vmem:[#allocation10 + $0x100] sm:$0xff]  ;;  %v1501_v60 = vld [vmem:[%s3423_s8] sm:$0xff] }
 0x346   : > { %v2438_v1 = vpack.c.bf16 %v1408_v62, %v1406_v61  ;;  %v2466_v62 = vpack.c.bf16 %v1623_v56, %v1621_v27  ;;  %v1950_v27 = vld [vmem:[%s3426_s11 + $0xa0] sm:$0xff]  ;;  %v1951_v56 = vld [vmem:[%s3426_s11 + $0xa8] sm:$0xff] }
 0x347   : > { %2413 = vmatpush1.bf16.msra.mxu1 %v2412_v7  ;;  %v1412_v7 = vld [vmem:[#allocation9 + $0x178] sm:$0xff] }
 0x348   : > { %2385 = vmatpush1.bf16.msra.mxu0 %v2384_v8  ;;  %2415 = vmatprep.subr.bf16.mxu1 %v2414_v10  ;;  %v2440_v8 = vpack.c.bf16 %v1407_v3, %v1405_v2  ;;  %v2442_v9 = vpack.c.bf16 %v1412_v7, %v1410_v5  ;;  %v1409_v10 = vld [vmem:[#allocation9 + $0x160] sm:$0xff]  ;;  %v1625_v2 = vld [vmem:[#allocation10 + $0x148] sm:$0xff]  ;;  %v1627_v3 = vld [vmem:[#allocation10 + $0x158] sm:$0xff] }
 0x349   : > { %2387 = vmatprep.subr.bf16.mxu0 %v2386_v13  ;;  %v1416_v13 = vld [vmem:[#allocation9 + $0x198] sm:$0xff]  ;;  %v2444_v14 = vpack.c.bf16 %v1411_v11, %v1409_v10  ;;  %v2470_v7 = vpack.c.bf16 %v1627_v3, %v1625_v2  ;;  %v1629_v10 = vld [vmem:[#allocation10 + $0x168] sm:$0xff]  ;;  %v1584_v3 = vld [vmem:[#allocation10] sm:$0xff] }
 0x34a   : > { %v2446_v15 = vpack.c.bf16 %v1416_v13, %v1414_v12  ;;  %v1631_v11 = vld [vmem:[#allocation10 + $0x178] sm:$0xff] }
 0x34b   : > { %2417 = vmatpush1.bf16.msra.mxu1 %v2416_v19  ;;  %v1420_v19 = vld [vmem:[#allocation9 + $0x1b8] sm:$0xff]  ;;  %v2474_v13 = vpack.c.bf16 %v1631_v11, %v1629_v10 }
 0x34c   : > { %2389 = vmatpush1.bf16.msra.mxu0 %v2388_v20  ;;  %2419 = vmatprep.subr.bf16.mxu1 %v2418_v22  ;;  %v2448_v20 = vpack.c.bf16 %v1415_v17, %v1413_v16  ;;  %v2450_v21 = vpack.c.bf16 %v1420_v19, %v1418_v18  ;;  %v1417_v22 = vld [vmem:[#allocation9 + $0x1a0] sm:$0xff]  ;;  %v1633_v16 = vld [vmem:[#allocation10 + $0x188] sm:$0xff]  ;;  %v1635_v17 = vld [vmem:[#allocation10 + $0x198] sm:$0xff] }
 0x34d   : > { %2391 = vmatprep.subr.bf16.mxu0 %v2390_v25  ;;  %v2452_v24 = vpack.c.bf16 %v1419_v23, %v1417_v22  ;;  %v1422_v25 = vld [vmem:[#allocation9 + $0x1c8] sm:$0xff]  ;;  %v2478_v19 = vpack.c.bf16 %v1635_v17, %v1633_v16  ;;  %v1595_v16 = vld [vmem:[#allocation10 + $0x58] sm:$0xff] }
 0x34e   : > { %v2454_v29 = vpack.c.bf16 %v1424_v28, %v1422_v25  ;;  %v1637_v23 = vld [vmem:[#allocation10 + $0x1a8] sm:$0xff]  ;;  %v1636_v28 = vld [vmem:[#allocation10 + $0x1a0] sm:$0xff] }
 0x34f   : > { %2421 = vmatpush1.bf16.msra.mxu1 %v2420_v33  ;;  %v1426_v33 = vld [vmem:[#allocation9 + $0x1e8] sm:$0xff] }
 0x350   : > { %2393 = vmatpush1.bf16.msra.mxu0 %v2392_v34  ;;  %2423 = vmatprep.subr.bf16.mxu1 %v2422_v35  ;;  %v1428_v34 = vld [vmem:[#allocation9 + $0x1f8] sm:$0xff] }
 0x351   : > { %2395 = vmatprep.subr.bf16.mxu0 %v2394_v38  ;;  %v2458_v35 = vpack.c.bf16 %v1428_v34, %v1426_v33  ;;  %v2460_v38 = vpack.c.bf16 %v1427_v37, %v1425_v36  ;;  %v1640_v34 = vld [vmem:[#allocation10 + $0x1c0] sm:$0xff]  ;;  %v1645_v37 = vld [vmem:[#allocation10 + $0x1e8] sm:$0xff] }
 0x353   : > { %2425 = vmatpush1.bf16.msra.mxu1 %v2424_v41  ;;  %v1027_v41 = vld [vmem:[%s3421_s6] sm:$0x3] }
 0x354   : > { %2397 = vmatpush1.bf16.msra.mxu0 %v2396_v42  ;;  %2427 = vmatprep.subr.bf16.mxu1 %v2426_v48  ;;  %v1353_v42 = vrot.slane %v1027_v41, %v3215_v4  ;;  %v1357_v44 = vrot.slane %v1027_v41, %v3220_v6  ;;  %v1646_v41 = vld [vmem:[#allocation10 + $0x1f0] sm:$0xff] }
 0x355   : > { %2217 = vmatprep.subr.mxu0 %v2885_v0 }
 0x357   : > { %1341 = vmatmul.mubr.f32.vlgmr.msra.gmra.mrb[6].mxu0 %v1274_v45  ;;  %2429 = vmatpush1.bf16.msra.mxu1 %v2428_v51 }
 0x358   : > { %2431 = vmatprep.subr.bf16.mxu1 %v2430_v26  ;;  %2219 = vmatprep.mubr.msk.f32.mxu0 %vm2886_vm3, %v2885_v0  ;;  %v1618_v26 = vld [vmem:[#allocation10 + $0x110] sm:$0xff] }
 0x359   : > { %v2464_v61 = vpack.c.bf16 %v1618_v26, %v1616_v54  ;;  %v1932_v26 = vld [vmem:[%s3426_s11 + $0x10] sm:$0xff] }
 0x35b   : > { %2433 = vmatpush1.bf16.msra.mxu1 %v2432_v57 }
 0x35c   : > { %2435 = vmatprep.subr.bf16.mxu1 %v2434_v58  ;;  %v2462_v58 = vpack.c.bf16 %v1619_v53, %v1617_v52  ;;  %v1949_v52 = vld [vmem:[%s3426_s11 + $0x98] sm:$0xff] }
 0x35f   : > { %2437 = vmatpush1.bf16.msra.mxu1 %v2436_v63  ;;  %v1620_v63 = vld [vmem:[#allocation10 + $0x120] sm:$0xff] }
 0x360   : > { %2439 = vmatprep.subr.bf16.mxu1 %v2438_v1  ;;  %v1622_v1 = vld [vmem:[#allocation10 + $0x130] sm:$0xff] }
 0x361   : > { %v2468_v5 = vpack.c.bf16 %v1622_v1, %v1620_v63 }
 0x363   : > { %2441 = vmatpush1.bf16.msra.mxu1 %v2440_v8  ;;  %v1624_v8 = vld [vmem:[#allocation10 + $0x140] sm:$0xff] }
 0x364   : > { %2443 = vmatprep.subr.bf16.mxu1 %v2442_v9  ;;  %v1626_v9 = vld [vmem:[#allocation10 + $0x150] sm:$0xff] }
 0x365   : > { %v2472_v12 = vpack.c.bf16 %v1626_v9, %v1624_v8  ;;  %v1591_v8 = vld [vmem:[#allocation10 + $0x38] sm:$0xff] }
 0x367   : > { %2445 = vmatpush1.bf16.msra.mxu1 %v2444_v14  ;;  %v1628_v14 = vld [vmem:[#allocation10 + $0x160] sm:$0xff] }
 0x368   : > { %2447 = vmatprep.subr.bf16.mxu1 %v2446_v15  ;;  %v1630_v15 = vld [vmem:[#allocation10 + $0x170] sm:$0xff] }
 0x369   : > { %v2476_v18 = vpack.c.bf16 %v1630_v15, %v1628_v14  ;;  %v1590_v14 = vld [vmem:[#allocation10 + $0x30] sm:$0xff]  ;;  %v1593_v15 = vld [vmem:[#allocation10 + $0x48] sm:$0xff] }
 0x36b   : > { %2449 = vmatpush1.bf16.msra.mxu1 %v2448_v20  ;;  %v1632_v20 = vld [vmem:[#allocation10 + $0x180] sm:$0xff] }
 0x36c   : > { %2451 = vmatprep.subr.bf16.mxu1 %v2450_v21  ;;  %v1634_v21 = vld [vmem:[#allocation10 + $0x190] sm:$0xff] }
 0x36d   : > { %v2480_v22 = vpack.c.bf16 %v1634_v21, %v1632_v20  ;;  %v1594_v20 = vld [vmem:[#allocation10 + $0x50] sm:$0xff]  ;;  %v1597_v21 = vld [vmem:[#allocation10 + $0x68] sm:$0xff] }
 0x36f   : > { %2453 = vmatpush1.bf16.msra.mxu1 %v2452_v24  ;;  %v1639_v24 = vld [vmem:[#allocation10 + $0x1b8] sm:$0xff] }
 0x370   : > { %2455 = vmatprep.subr.bf16.mxu1 %v2454_v29  ;;  %v2482_v25 = vpack.c.bf16 %v1639_v24, %v1637_v23  ;;  %v1638_v29 = vld [vmem:[#allocation10 + $0x1b0] sm:$0xff] }
 0x371   : > { %v2484_v30 = vpack.c.bf16 %v1638_v29, %v1636_v28  ;;  %v1598_v28 = vld [vmem:[#allocation10 + $0x70] sm:$0xff]  ;;  %v1601_v29 = vld [vmem:[#allocation10 + $0x88] sm:$0xff] }
 0x373   : > { %2457 = vmatpush1.bf16.msra.mxu1 %v2456_v32  ;;  %v1643_v32 = vld [vmem:[#allocation10 + $0x1d8] sm:$0xff] }
 0x374   : > { %2459 = vmatprep.subr.bf16.mxu1 %v2458_v35  ;;  %v2486_v33 = vpack.c.bf16 %v1643_v32, %v1641_v31  ;;  %v1642_v35 = vld [vmem:[#allocation10 + $0x1d0] sm:$0xff] }
 0x375   : > { %v2488_v36 = vpack.c.bf16 %v1642_v35, %v1640_v34  ;;  %v1602_v34 = vld [vmem:[#allocation10 + $0x90] sm:$0xff]  ;;  %v1605_v35 = vld [vmem:[#allocation10 + $0xa8] sm:$0xff] }
 0x377   : > { %2461 = vmatpush1.bf16.msra.mxu1 %v2460_v38  ;;  %v1647_v38 = vld [vmem:[#allocation10 + $0x1f8] sm:$0xff] }
 0x40d   : > { %v1164_v39 = vpop.f32.mrb[4].mxu1 }
 0x40e   : > { %v1166_v40 = vpop.f32.mrb[5].mxu1 }
 0x42a   : > { %v1342_v43 = vpop.f32.mrb[6].mxu0 }
 0x42b   : > { %v2590_v45 = vadd.f32 %v1342_v43, %v1164_v39  ;;  %v1344_v46 = vpop.f32.mrb[7].mxu0  ;;  %v1644_v39 = vld [vmem:[#allocation10 + $0x1e0] sm:$0xff]  ;;  %v1587_v43 = vld [vmem:[#allocation10 + $0x18] sm:$0xff] }
 0x42c   : > { %v2591_v47 = vadd.f32 %v1344_v46, %v1166_v40  ;;  %v2490_v40 = vpack.c.bf16 %v1647_v38, %v1645_v37  ;;  %v1946_v46 = vld [vmem:[%s3426_s11 + $0x80] sm:$0xff] }
 0x42d   : > { %v1360_v48 = vadd.f32 %v2590_v45, %v1353_v42  ;;  %v1585_v42 = vld [vmem:[#allocation10 + $0x8] sm:$0xff] }
 0x42e   : > { %v1361_v49 = vadd.f32 %v2591_v47, %v1357_v44  ;;  %v2492_v44 = vpack.c.bf16 %v1646_v41, %v1644_v39  ;;  %v2494_v45 = vpack.c.bf16 %v1587_v43, %v1585_v42  ;;  %v1947_v47 = vld [vmem:[%s3426_s11 + $0x88] sm:$0xff]  ;;  %v1604_v39 = vld [vmem:[#allocation10 + $0xa0] sm:$0xff]  ;;  %v1609_v41 = vld [vmem:[#allocation10 + $0xc8] sm:$0xff] }
 0x42f   : > { %v1362_v51 = vmax.f32 %v1360_v48, 0.0  ;;  %v1930_v48 = vld [vmem:[%s3426_s11] sm:$0xff]  ;;  %v1611_v42 = vld [vmem:[#allocation10 + $0xd8] sm:$0xff] }
 0x430   : > { %v1363_v50 = vmax.f32 %v1361_v49, 0.0  ;;  %v2558_v49 = vpack.c.bf16 %v1947_v47, %v1946_v46  ;;  %v1610_v46 = vld [vmem:[#allocation10 + $0xd0] sm:$0xff]  ;;  %v1613_v47 = vld [vmem:[#allocation10 + $0xe8] sm:$0xff] }
 0x432   : > { %1493 = vmatprep.mubr.f32.mxu1 %v1363_v50  ;;  %v1931_v50 = vld [vmem:[%s3426_s11 + $0x8] sm:$0xff]  ;;  %2559 = vmatprep.subr.bf16.mxu1 %v2558_v49 }
 0x433   : > { %1494 = vmatmul.mubr.f32.vlgmr.msra.gmra.mrb[6].mxu1 %v1362_v51  ;;  %v1948_v51 = vld [vmem:[%s3426_s11 + $0x90] sm:$0xff]  ;;  %v2560_v53 = vpack.c.bf16 %v1931_v50, %v1930_v48 }
 0x434   : > { %v2562_v54 = vpack.c.bf16 %v1949_v52, %v1948_v51  ;;  %v1615_v48 = vld [vmem:[#allocation10 + $0xf8] sm:$0xff]  ;;  %v1612_v51 = vld [vmem:[#allocation10 + $0xe0] sm:$0xff]  ;;  %v1614_v52 = vld [vmem:[#allocation10 + $0xf0] sm:$0xff] }
 0x435   : > { %2561 = vmatpush3.bf16.msra.mxu1 %v2560_v53  ;;  %v2522_v50 = vpack.c.bf16 %v1615_v48, %v1613_v47  ;;  %v1794_v53 = vld [vmem:[#allocation10 + $0x208] sm:$0xff]  ;;  %v1955_v48 = vld [vmem:[%s3426_s11 + $0xc8] sm:$0xff] }
 0x436   : > { %2563 = vmatprep.subr.bf16.mxu1 %v2562_v54  ;;  %v1796_v54 = vld [vmem:[#allocation10 + $0x218] sm:$0xff] }
 0x506   : > { %v1495_v55 = vpop.f32.mrb[6].mxu1 }
 0x507   : > { %v1497_v57 = vpop.f32.mrb[7].mxu1 }
 0x508   : > { %v1500_v59 = vmax.f32 %v1495_v55, %v1497_v57  ;;  %v1933_v55 = vld [vmem:[%s3426_s11 + $0x18] sm:$0xff] }
 0x509   : > { %v2564_v57 = vpack.c.bf16 %v1933_v55, %v1932_v26  ;;  %v2524_v26 = vpack.c.bf16 %v1614_v52, %v1612_v51  ;;  %v2526_v55 = vpack.c.bf16 %v1796_v54, %v1794_v53  ;;  %v1939_v51 = vld [vmem:[%s3426_s11 + $0x48] sm:$0xff]  ;;  %v1956_v53 = vld [vmem:[%s3426_s11 + $0xd0] sm:$0xff]  ;;  %v1957_v54 = vld [vmem:[%s3426_s11 + $0xd8] sm:$0xff] }
 0x50a   : > { %2218 = vmatpush3.msra.mxu0 %v1500_v59  ;;  %v1934_v59 = vld [vmem:[%s3426_s11 + $0x20] sm:$0xff] }
 0x50b   : > { %2220 = vmatmul.mubr.msk.f32.vlgmr.msra.gmra.mrb[8].mxu0 %vm1502_vm4, %v1501_v60  ;;  %2463 = vmatprep.subr.bf16.mxu0 %v2462_v58  ;;  %v2566_v58 = vpack.c.bf16 %v1951_v56, %v1950_v27  ;;  %v1935_v60 = vld [vmem:[%s3426_s11 + $0x28] sm:$0xff]  ;;  %v1793_v27 = vld [vmem:[#allocation10 + $0x200] sm:$0xff] }
 0x50c   : > { %2465 = vmatpush1.bf16.msra.mxu0 %v2464_v61  ;;  %1715 = vmatprep.mubr.f32.mxu0 %v2885_v0  ;;  %v2568_v61 = vpack.c.bf16 %v1935_v60, %v1934_v59  ;;  %v1795_v56 = vld [vmem:[#allocation10 + $0x210] sm:$0xff] }
 0x50d   : > { %2467 = vmatprep.subr.bf16.mxu0 %v2466_v62  ;;  %2565 = vmatpush3.bf16.msra.mxu1 %v2564_v57  ;;  %v1798_v57 = vld [vmem:[#allocation10 + $0x228] sm:$0xff]  ;;  %v2528_v59 = vpack.c.bf16 %v1795_v56, %v1793_v27  ;;  %v1941_v27 = vld [vmem:[%s3426_s11 + $0x58] sm:$0xff] }
 0x50e   : > { %2567 = vmatprep.subr.bf16.mxu1 %v2566_v58  ;;  %v1800_v58 = vld [vmem:[#allocation10 + $0x238] sm:$0xff] }
 0x50f   : > { %v2530_v60 = vpack.c.bf16 %v1800_v58, %v1798_v57  ;;  %v1958_v57 = vld [vmem:[%s3426_s11 + $0xe0] sm:$0xff]  ;;  %v1959_v58 = vld [vmem:[%s3426_s11 + $0xe8] sm:$0xff] }
 0x510   : > { %2469 = vmatpush1.bf16.msra.mxu0 %v2468_v5  ;;  %v1586_v5 = vld [vmem:[#allocation10 + $0x10] sm:$0xff] }
 0x511   : > { %2471 = vmatprep.subr.bf16.mxu0 %v2470_v7  ;;  %2569 = vmatpush3.bf16.msra.mxu1 %v2568_v61  ;;  %v1589_v7 = vld [vmem:[#allocation10 + $0x28] sm:$0xff]  ;;  %v2496_v10 = vpack.c.bf16 %v1586_v5, %v1584_v3  ;;  %v1797_v61 = vld [vmem:[#allocation10 + $0x220] sm:$0xff] }
 0x512   : > { %v1801_v5 = vld [vmem:[#allocation10 + $0x240] sm:$0xff] }
 0x514   : > { %2473 = vmatpush1.bf16.msra.mxu0 %v2472_v12  ;;  %v2498_v12 = vpack.c.bf16 %v1591_v8, %v1589_v7  ;;  %v1803_v7 = vld [vmem:[#allocation10 + $0x250] sm:$0xff]  ;;  %v1806_v8 = vld [vmem:[#allocation10 + $0x268] sm:$0xff] }
 0x515   : > { %2475 = vmatprep.subr.bf16.mxu0 %v2474_v13  ;;  %v1588_v13 = vld [vmem:[#allocation10 + $0x20] sm:$0xff] }
 0x516   : > { %v2500_v17 = vpack.c.bf16 %v1590_v14, %v1588_v13  ;;  %v1805_v13 = vld [vmem:[#allocation10 + $0x260] sm:$0xff]  ;;  %v1807_v14 = vld [vmem:[#allocation10 + $0x270] sm:$0xff] }
 0x518   : > { %2477 = vmatpush1.bf16.msra.mxu0 %v2476_v18  ;;  %v2502_v18 = vpack.c.bf16 %v1595_v16, %v1593_v15  ;;  %v1810_v15 = vld [vmem:[#allocation10 + $0x288] sm:$0xff]  ;;  %v1812_v16 = vld [vmem:[#allocation10 + $0x298] sm:$0xff] }
 0x519   : > { %2479 = vmatprep.subr.bf16.mxu0 %v2478_v19  ;;  %v1592_v19 = vld [vmem:[#allocation10 + $0x40] sm:$0xff] }
 0x51a   : > { %v2504_v23 = vpack.c.bf16 %v1594_v20, %v1592_v19  ;;  %v1809_v19 = vld [vmem:[#allocation10 + $0x280] sm:$0xff]  ;;  %v1814_v20 = vld [vmem:[#allocation10 + $0x2a8] sm:$0xff] }
 0x51c   : > { %2481 = vmatpush1.bf16.msra.mxu0 %v2480_v22  ;;  %v1599_v22 = vld [vmem:[#allocation10 + $0x78] sm:$0xff] }
 0x51d   : > { %2483 = vmatprep.subr.bf16.mxu0 %v2482_v25  ;;  %v2506_v24 = vpack.c.bf16 %v1599_v22, %v1597_v21  ;;  %v1596_v25 = vld [vmem:[#allocation10 + $0x60] sm:$0xff]  ;;  %v1816_v21 = vld [vmem:[#allocation10 + $0x2b8] sm:$0xff] }
 0x51e   : > { %v2508_v31 = vpack.c.bf16 %v1598_v28, %v1596_v25  ;;  %v1815_v25 = vld [vmem:[#allocation10 + $0x2b0] sm:$0xff]  ;;  %v1818_v28 = vld [vmem:[#allocation10 + $0x2c8] sm:$0xff] }
 0x520   : > { %2485 = vmatpush1.bf16.msra.mxu0 %v2484_v30  ;;  %v1603_v30 = vld [vmem:[#allocation10 + $0x98] sm:$0xff] }
 0x521   : > { %2487 = vmatprep.subr.bf16.mxu0 %v2486_v33  ;;  %v2510_v32 = vpack.c.bf16 %v1603_v30, %v1601_v29  ;;  %v1600_v33 = vld [vmem:[#allocation10 + $0x80] sm:$0xff]  ;;  %v1820_v29 = vld [vmem:[#allocation10 + $0x2d8] sm:$0xff] }
 0x522   : > { %v2512_v37 = vpack.c.bf16 %v1602_v34, %v1600_v33  ;;  %v1819_v33 = vld [vmem:[#allocation10 + $0x2d0] sm:$0xff]  ;;  %v1822_v34 = vld [vmem:[#allocation10 + $0x2e8] sm:$0xff] }
 0x524   : > { %2489 = vmatpush1.bf16.msra.mxu0 %v2488_v36  ;;  %v1607_v36 = vld [vmem:[#allocation10 + $0xb8] sm:$0xff] }
 0x525   : > { %2491 = vmatprep.subr.bf16.mxu0 %v2490_v40  ;;  %v2514_v38 = vpack.c.bf16 %v1607_v36, %v1605_v35  ;;  %v1606_v40 = vld [vmem:[#allocation10 + $0xb0] sm:$0xff]  ;;  %v1824_v35 = vld [vmem:[#allocation10 + $0x2f8] sm:$0xff] }
 0x526   : > { %v2516_v43 = vpack.c.bf16 %v1606_v40, %v1604_v39  ;;  %v1823_v39 = vld [vmem:[#allocation10 + $0x2f0] sm:$0xff] }
 0x528   : > { %2493 = vmatpush1.bf16.msra.mxu0 %v2492_v44  ;;  %v2518_v44 = vpack.c.bf16 %v1611_v42, %v1609_v41  ;;  %v1952_v42 = vld [vmem:[%s3426_s11 + $0xb0] sm:$0xff] }
 0x529   : > { %2495 = vmatprep.subr.bf16.mxu0 %v2494_v45  ;;  %v1608_v45 = vld [vmem:[#allocation10 + $0xc0] sm:$0xff] }
 0x52a   : > { %v2520_v49 = vpack.c.bf16 %v1610_v46, %v1608_v45  ;;  %v1936_v45 = vld [vmem:[%s3426_s11 + $0x30] sm:$0xff]  ;;  %v1937_v46 = vld [vmem:[%s3426_s11 + $0x38] sm:$0xff] }
 0x52b   : > { %v2572_v47 = vpack.c.bf16 %v1937_v46, %v1936_v45 }
 0x5de   : > { %v1572_v62 = vpop.f32.mrb[8].mxu0 }
 0x5df   : > { %v1577_v63 = vrot.slane %v1572_v62, 4  ;;  %v2221_v1 = vpop.f32.mrb[9].mxu0 }
 0x5e0   : > { %v1804_v1 = vld [vmem:[#allocation10 + $0x258] sm:$0xff] }
 0x5e1   : > { %v1579_v2 = vmax.f32 %v1572_v62, %v1577_v63  ;;  %v1799_v62 = vld [vmem:[#allocation10 + $0x230] sm:$0xff]  ;;  %v1802_v63 = vld [vmem:[#allocation10 + $0x248] sm:$0xff] }
 0x5e2   : > { %v2534_v3 = vpack.c.bf16 %v1804_v1, %v1802_v63  ;;  %v1960_v63 = vld [vmem:[%s3426_s11 + $0xf0] sm:$0xff]  ;;  %v1961_v1 = vld [vmem:[%s3426_s11 + $0xf8] sm:$0xff] }
 0x5e3   : > { %1580 = vst [vmem:[#allocation3 + $0x1] sm:$0xf] %v1579_v2  ;;  %v2532_v2 = vpack.c.bf16 %v1799_v62, %v1797_v61  ;;  %v1943_v61 = vld [vmem:[%s3426_s11 + $0x68] sm:$0xff] }
 0x5ea   : > { %v3293_v9 = vld [vmem:[#allocation3] sm:$0x3f] }
 0x5eb   : > { %v1649_v11 = vrot.slane %v3293_v9, 1  ;;  %v1825_v41 = vrot.slane %v3293_v9, 2 }
 0x5ed   : > { %1716 = vmatmul.mubr.f32.vlgmr.msra.gmra.mrb[10].mxu0 %v1649_v11  ;;  %v2536_v11 = vpack.c.bf16 %v1803_v7, %v1801_v5  ;;  %v1945_v5 = vld [vmem:[%s3426_s11 + $0x78] sm:$0xff] }
 0x5ee   : > { %2497 = vmatpush1.bf16.msra.mxu0 %v2496_v10  ;;  %1786 = vmatprep.mubr.f32.mxu0 %v2885_v0  ;;  %v1808_v10 = vld [vmem:[#allocation10 + $0x278] sm:$0xff] }
 0x5ef   : > { %2499 = vmatprep.subr.bf16.mxu0 %v2498_v12  ;;  %v2538_v12 = vpack.c.bf16 %v1808_v10, %v1806_v8  ;;  %v1583_v8 = vld [vmem:[%s3425_s10] sm:$0x3] }
 0x5f0   : > { %v1904_v10 = vrot.slane %v1583_v8, %v3215_v4 }
 0x5f2   : > { %2501 = vmatpush1.bf16.msra.mxu0 %v2500_v17  ;;  %v2540_v17 = vpack.c.bf16 %v1807_v14, %v1805_v13 }
 0x5f3   : > { %2503 = vmatprep.subr.bf16.mxu0 %v2502_v18  ;;  %v2542_v18 = vpack.c.bf16 %v1812_v16, %v1810_v15 }
 0x5f6   : > { %2505 = vmatpush1.bf16.msra.mxu0 %v2504_v23  ;;  %v2546_v23 = vpack.c.bf16 %v1816_v21, %v1814_v20 }
 0x5f7   : > { %2507 = vmatprep.subr.bf16.mxu0 %v2506_v24  ;;  %v1813_v24 = vld [vmem:[#allocation10 + $0x2a0] sm:$0xff] }
 0x5f8   : > { %v2548_v30 = vpack.c.bf16 %v1815_v25, %v1813_v24 }
 0x5fa   : > { %2509 = vmatpush1.bf16.msra.mxu0 %v2508_v31  ;;  %v2550_v31 = vpack.c.bf16 %v1820_v29, %v1818_v28 }
 0x5fb   : > { %2511 = vmatprep.subr.bf16.mxu0 %v2510_v32  ;;  %v1817_v32 = vld [vmem:[#allocation10 + $0x2c0] sm:$0xff] }
 0x5fc   : > { %v2552_v36 = vpack.c.bf16 %v1819_v33, %v1817_v32  ;;  %v1962_v32 = vld [vmem:[%s3463_s18] sm:$0x1] }
 0x5fe   : > { %2513 = vmatpush1.bf16.msra.mxu0 %v2512_v37  ;;  %v2554_v37 = vpack.c.bf16 %v1824_v35, %v1822_v34 }
 0x5ff   : > { %2515 = vmatprep.subr.bf16.mxu0 %v2514_v38  ;;  %v1821_v38 = vld [vmem:[#allocation10 + $0x2e0] sm:$0xff] }
 0x600   : > { %v2556_v40 = vpack.c.bf16 %v1823_v39, %v1821_v38 }
 0x602   : > { %2517 = vmatpush1.bf16.msra.mxu0 %v2516_v43  ;;  %v1953_v43 = vld [vmem:[%s3426_s11 + $0xb8] sm:$0xff] }
 0x603   : > { %2519 = vmatprep.subr.bf16.mxu0 %v2518_v44  ;;  %v2570_v44 = vpack.c.bf16 %v1953_v43, %v1952_v42 }
 0x605   : > { %2571 = vmatprep.subr.bf16.mxu1 %v2570_v44 }
 0x606   : > { %2521 = vmatpush1.bf16.msra.mxu0 %v2520_v49  ;;  %2573 = vmatpush3.bf16.msra.mxu1 %v2572_v47 }
 0x607   : > { %2523 = vmatprep.subr.bf16.mxu0 %v2522_v50  ;;  %v1938_v50 = vld [vmem:[%s3426_s11 + $0x40] sm:$0xff] }
 0x608   : > { %v2576_v52 = vpack.c.bf16 %v1939_v51, %v1938_v50 }
 0x60a   : > { %2525 = vmatpush1.bf16.msra.mxu0 %v2524_v26  ;;  %v2578_v26 = vpack.c.bf16 %v1957_v54, %v1956_v53 }
 0x60b   : > { %2527 = vmatprep.subr.bf16.mxu0 %v2526_v55  ;;  %v1940_v55 = vld [vmem:[%s3426_s11 + $0x50] sm:$0xff] }
 0x60c   : > { %v2580_v56 = vpack.c.bf16 %v1941_v27, %v1940_v55 }
 0x60d   : > { %1787 = vmatmul.mubr.f32.vlgmr.msra.gmra.mrb[10].mxu0 %v3293_v9  ;;  %v1954_v9 = vld [vmem:[%s3426_s11 + $0xc0] sm:$0xff] }
 0x60e   : > { %2529 = vmatpush1.bf16.msra.mxu0 %v2528_v59  ;;  %1891 = vmatprep.mubr.f32.mxu0 %v2885_v0  ;;  %v1811_v0 = vld [vmem:[#allocation10 + $0x290] sm:$0xff]  ;;  %v2574_v49 = vpack.c.bf16 %v1955_v48, %v1954_v9  ;;  %v2582_v59 = vpack.c.bf16 %v1959_v58, %v1958_v57 }
 0x60f   : > { %2531 = vmatprep.subr.bf16.mxu0 %v2530_v60  ;;  %v2544_v22 = vpack.c.bf16 %v1811_v0, %v1809_v19  ;;  %v1942_v60 = vld [vmem:[%s3426_s11 + $0x60] sm:$0xff] }
 0x610   : > { %2575 = vmatprep.subr.bf16.mxu1 %v2574_v49  ;;  %v2584_v62 = vpack.c.bf16 %v1943_v61, %v1942_v60 }
 0x611   : > { %2577 = vmatpush3.bf16.msra.mxu1 %v2576_v52 }
 0x612   : > { %2533 = vmatpush1.bf16.msra.mxu0 %v2532_v2  ;;  %2579 = vmatprep.subr.bf16.mxu1 %v2578_v26  ;;  %v2586_v2 = vpack.c.bf16 %v1961_v1, %v1960_v63 }
 0x613   : > { %2535 = vmatprep.subr.bf16.mxu0 %v2534_v3  ;;  %v1944_v3 = vld [vmem:[%s3426_s11 + $0x70] sm:$0xff] }
 0x614   : > { %v2588_v7 = vpack.c.bf16 %v1945_v5, %v1944_v3 }
 0x615   : > { %2581 = vmatpush3.bf16.msra.mxu1 %v2580_v56 }
 0x616   : > { %2537 = vmatpush1.bf16.msra.mxu0 %v2536_v11  ;;  %2583 = vmatprep.subr.bf16.mxu1 %v2582_v59  ;;  %v1908_v11 = vrot.slane %v1583_v8, %v3220_v6 }
 0x617   : > { %2539 = vmatprep.subr.bf16.mxu0 %v2538_v12 }
 0x619   : > { %2585 = vmatpush3.bf16.msra.mxu1 %v2584_v62 }
 0x61a   : > { %2541 = vmatpush1.bf16.msra.mxu0 %v2540_v17  ;;  %2587 = vmatprep.subr.bf16.mxu1 %v2586_v2 }
 0x61b   : > { %2543 = vmatprep.subr.bf16.mxu0 %v2542_v18 }
 0x61d   : > { %2589 = vmatpush3.bf16.msra.mxu1 %v2588_v7 }
 0x61e   : > { %2545 = vmatpush1.bf16.msra.mxu0 %v2544_v22 }
 0x61f   : > { %2547 = vmatprep.subr.bf16.mxu0 %v2546_v23 }
 0x622   : > { %2549 = vmatpush1.bf16.msra.mxu0 %v2548_v30 }
 0x623   : > { %2551 = vmatprep.subr.bf16.mxu0 %v2550_v31 }
 0x626   : > { %2553 = vmatpush1.bf16.msra.mxu0 %v2552_v36 }
 0x627   : > { %2555 = vmatprep.subr.bf16.mxu0 %v2554_v37 }
 0x62a   : > { %2557 = vmatpush1.bf16.msra.mxu0 %v2556_v40 }
 0x62d   : > { %1892 = vmatmul.mubr.f32.vlgmr.msra.gmra.mrb[10].mxu0 %v1825_v41 }
 0x700   : > { %v1893_v12 = vpop.f32.mrb[10].mxu0 }
 0x701   : > { %v1911_v13 = vadd.f32 %v1904_v10, %v1893_v12  ;;  %v1895_v14 = vpop.f32.mrb[11].mxu0 }
 0x702   : > { %v1912_v15 = vadd.f32 %v1908_v11, %v1895_v14 }
 0x703   : > { %v1913_v16 = vmax.f32 %v1911_v13, 0.0 }
 0x704   : > { %v1914_v17 = vmax.f32 %v1912_v15, 0.0 }
 0x705   : > { %v1916_v18 = vsel %vm1915_vm5, %v1913_v16, 0.0 }
 0x706   : > { %v1917_v19 = vrot.slane %v1916_v18, 4  ;;  %v1923_v0 = vsel %vm1915_vm5, %v1914_v17, 0.0 }
 0x707   : > { %v1924_v20 = vrot.slane %v1923_v0, 4 }
 0x708   : > { %v1918_v21 = vadd.f32 %v1917_v19, %v1916_v18 }
 0x709   : > { %v1925_v22 = vadd.f32 %v1924_v20, %v1923_v0 }
 0x70a   : > { %v1919_v23 = vrot.slane %v1918_v21, 2 }
 0x70b   : > { %v1926_v24 = vrot.slane %v1925_v22, 2 }
 0x70c   : > { %v1920_v4 = vadd.f32 %v1919_v23, %v1918_v21 }
 0x70d   : > { %v1927_v25 = vadd.f32 %v1926_v24, %v1925_v22 }
 0x70e   : > { %v1921_v6 = vrot.slane %v1920_v4, 1 }
 0x70f   : > { %v1928_v28 = vrot.slane %v1927_v25, 1 }
 0x710   : > { %v1922_v30 = vadd.f32 %v1921_v6, %v1920_v4 }
 0x711   : > { %v1929_v29 = vadd.f32 %v1928_v28, %v1927_v25 }
 0x713   : > { %2027 = vmatprep.mubr.f32.mxu1 %v1929_v29 }
 0x714   : > { %2028 = vmatmul.mubr.f32.vlgmr.msra.gmra.mrb[8].mxu1 %v1922_v30 }
 0x7e7   : > { %v2207_v31 = vpop.f32.mrb[8].mxu1 }
 0x7e8   : > { %v2208_v33 = vpop.f32.mrb[9].mxu1 }
 0x7e9   : > { %v2209_v34 = vadd.f32 %v2208_v33, %v2207_v31 }
 0x7eb   : > { %v2030_v35 = vadd.f32 %v2209_v34, %v1962_v32 }
 0x7ed   : > { %2034 = vst.msk [vmem:[%s491_s21] sm:$0x1] %vm2033_vm6, %v2030_v35 }
 0x7ee   : > { %2816 = shalt.err (!%p2813_p0)
}
 0x7ef   : > { %s2817_s23 = scalar_lea.hbm %s3373_s16, 16  ;;  %s2821_s28 = scalar_lea.hbm %s3464_s22, 32 }
 0x7f0   : > { %p2818_p10 = scmp.ne.s32.totalorder %s3373_s16, %s2817_s23  ;;  %p2822_p4 = scmp.lt.u32.totalorder %s3373_s16, %s3464_s22 }
 0x7f1   : > { %p2823_p12 = scmp.lt.u32.totalorder %s2821_s28, %s2817_s23  ;;  %p2825_p8 = scmp.lt.u32.totalorder %s2817_s23, %s3373_s16 }
 0x7f2   : > { %p2819_p2 = pnand %p2818_p10, %p3465_p11 }
 0x7f3   : > { %p2824_p7 = por %p2823_p12, %p2822_p4 }
 0x7f4   : > { %p2820_p3 = pneg %p2819_p2 }
 0x7f5   : > { %p2826_p13 = por %p2825_p8, %p2824_p7 }
 0x7f7   : > { %p2827_p1 = pnand %p2826_p13, %p2820_p3 }
 0x7f9   : > { %2830 = shalt.err (!%p2827_p1)
}
 0x7fa   : > { %2623 = dma.vmem_to_hbm [thread:$0]  (%p3465_p11), %s3375_s24, 16, %s3373_s16, %s2036_s30  }
 0x7fb PF: > { %s3466_s21 = sld [smem:[#allocation19_spill]]  ;;  %s3467_s15 = sld [smem:[#allocation17_spill]] }
 0x7fc   : > { %s3468_s27 = sld [smem:[#allocation23_spill]] }
 0x801   : > { %p2650_p6 = scmp.ge.s32.totalorder %s3466_s21, 2  ;;  %s2060_s12 = sand.u32 1, %s3467_s15  }
 0x802   : > { %p3469_p9 = scmp.ne.s32.totalorder %s3468_s27, 0  ;;  %s2061_s29 = scalar_lea.sflag [#allocation6], %s2060_s12 }
 0x804   : > { %p2639_p5 = pnand %p2650_p6, %p3469_p9 }
 0x806   : > { %2860 = dma.done.wait (!%p2639_p5), %s2061_s29, 16  }
 0x807   : > { %2862 = vsyncadd (!%p2639_p5), %s2061_s29, 4294967280  ;;  %s3470_s28 = sld [smem:[#allocation20_spill]]  ;;  %s3471_s20 = sld [smem:[#allocation18_spill]] }
 0x808   : > { %s3472_s27 = sld [smem:[#allocation21_spill]]  ;;  %s3473_s25 = smov %s2869_s26 }
 0x80d   : > { %p26_p0 = scmp.ge.s32.totalorder %s3470_s28, 4   ;;  %s3474_s26 = smov %s3471_s20 }
 0x80f   :  { %28 = sbr.rel (!%p26_p0) target bundleno = 9 (0x9), region = 124 }
 0x816   :  { %2065 = vsyncpa [#allocation5], 1 }
 0x817   :  { %2067 = vsyncpa [#allocation5 + $0x1], 1 }
 0x818   :  { %2068 = vsyncpa [#allocation8], 1 }
 0x819   :  { %2069 = vsyncpa [#allocation11], 1 }
 0x81a   :  { %2070 = vsyncpa [#allocation6], 1 }
 0x81b   :  { %2072 = vsyncpa [#allocation6 + $0x1], 1 }

</bundles_post_ra>
